<compile_context>
chip_gen: v7x
topology: tpu7x:2x2x1
jax: 0.10.0
libtpu: 0.0.40
codegen_flags: <defaults>
</compile_context>

<pallas_src>
import jax
import jax.numpy as jnp
from jax import lax
from jax.experimental import pallas as pl
from jax.experimental.pallas import tpu as pltpu

AMBIENT = 0.3
DIFFUSE = 0.7
BG = (1.0, 1.0, 1.0)       # white background (PyTorch3D default blend color)
LIGHT = (0.0, 0.0, 1.0)    # directional light along +z
EPS = 1e-9
LANE = 128
Z_FAR = 1e10
TR_CAP = 512               # max sublane rows per pixel tile; VMEM-safe on v5e/v6e/v7x.
# TODO(synk): sweep TR in {64,128} on v5e (single store slot; large rolled-loop
# carries spill to VMEM) vs {256,512} on v6e/v7x.


def _make_render_kernel(TR, F_pad, unroll):
    """Fused rasterize+shade kernel over a (TR, 128) tile of flattened pixels."""

    def kernel(coef_ref, pxy_ref, img_ref):
        # coef_ref : SMEM (B, F_pad*18) f32, per face:
        #   [a0,b0,d0, a1,b1,d1, dz0,dz1,z2, dr0,dr1,r2, dg0,dg1,g2, db0,db1,b2]
        #   edge coefficients are pre-divided by the signed area, so
        #   c0 = a0*px + b0*py + d0 (degenerate faces get d0 = -1 -> never inside).
        # pxy_ref  : VMEM (2, TR, 128) f32 : NDC x / y planes for this pixel tile.
        # img_ref  : VMEM (1, 4, TR, 128) f32 RGBA, channel-first, lane-dense.
        b = pl.program_id(0)
        px = pxy_ref[0]
        py = pxy_ref[1]

        init = (
            jnp.full((TR, LANE), Z_FAR, jnp.float32),   # best_z
            jnp.full((TR, LANE), BG[0], jnp.float32),   # r
            jnp.full((TR, LANE), BG[1], jnp.float32),   # g
            jnp.full((TR, LANE), BG[2], jnp.float32),   # b
        )

        # TODO(synk): for F >= ~64, reformulate as an MXU matmul: all of
        # c0/c1/zf/rf/gf/bf are affine in (px, py), so a (TR*128, 3) @ (3, 6*Fc)
        # per face-chunk moves ~2/3 of the VALU work onto the idle MXU; the VPU
        # would only keep the min-test / z-compare / selects.
        def body(f, carry):
            best_z, r, g, bl = carry
            o = f * 18

            a0 = coef_ref[b, o + 0]; b0 = coef_ref[b, o + 1]; d0 = coef_ref[b, o + 2]
            a1 = coef_ref[b, o + 3]; b1 = coef_ref[b, o + 4]; d1 = coef_ref[b, o + 5]
            dz0 = coef_ref[b, o + 6]; dz1 = coef_ref[b, o + 7]; zb = coef_ref[b, o + 8]
            dr0 = coef_ref[b, o + 9]; dr1 = coef_ref[b, o + 10]; r2 = coef_ref[b, o + 11]
            dg0 = coef_ref[b, o + 12]; dg1 = coef_ref[b, o + 13]; g2 = coef_ref[b, o + 14]
            db0 = coef_ref[b, o + 15]; db1 = coef_ref[b, o + 16]; b2 = coef_ref[b, o + 17]

            # barycentrics (screen-space / affine)
            c0 = a0 * px + b0 * py + d0
            c1 = a1 * px + b1 * py + d1
            c2 = 1.0 - c0 - c1
            zf = zb + c0 * dz0 + c1 * dz1

            closer = ((jnp.minimum(jnp.minimum(c0, c1), c2) >= 0.0)
                      & (zf > 0.0) & (zf < best_z))

            # no clip needed: selected only when `closer`, where the interpolant
            # is a convex combination of premultiplied colors in [0, 1].
            rf = r2 + c0 * dr0 + c1 * dr1
            gf = g2 + c0 * dg0 + c1 * dg1
            bf = b2 + c0 * db0 + c1 * db1

            return (jnp.where(closer, zf, best_z),
                    jnp.where(closer, rf, r),
                    jnp.where(closer, gf, g),
                    jnp.where(closer, bf, bl))

        _, r, g, bl = lax.fori_loop(0, F_pad, body, init, unroll=unroll)

        img_ref[0, 0] = r
        img_ref[0, 1] = g
        img_ref[0, 2] = bl
        img_ref[0, 3] = jnp.ones((TR, LANE), jnp.float32)  # hard_rgb_blend: alpha = 1

    return kernel


def mesh_renderer(verts, faces, vert_colors, image_size=16):
    """Render a batch of meshes -> (N, H, W, 4) RGBA float32 images."""
    B, V, _ = verts.shape
    F = faces.shape[1]
    H = W = int(image_size)
    HW = H * W

    # ---- pixel tiling: flatten pixels, pad to R_pad sublane rows x 128 lanes --
    R = (HW + LANE - 1) // LANE
    R_pad = max(8, ((R + 7) // 8) * 8)          # full 8-sublane unmasked stores
    if R_pad <= TR_CAP:
        TR = R_pad
    else:
        TR = 8
        for cand in (512, 256, 128, 64, 32, 16, 8):
            if R_pad % cand == 0:
                TR = cand
                break
    num_tiles = R_pad // TR
    # v7x has 2 TensorCores: make sure there are >= 2 "parallel" grid steps.
    while B * num_tiles < 2 and TR % 16 == 0:
        TR //= 2
        num_tiles = R_pad // TR

    # ---- face padding so the rolled loop can use a clean unroll factor --------
    if F <= 16:
        F_pad, unroll = F, True                 # fully unrolled
    else:
        F_pad, unroll = ((F + 7) // 8) * 8, 8   # partial unroll, immediates offsets

    # ---- wrapper-side precompute (plain JAX, not the hot path) ----------------
    gather = jax.vmap(lambda v, f: v[f])
    face_verts = gather(verts.astype(jnp.float32), faces)        # (B, F, 3, 3)
    face_cols = gather(vert_colors.astype(jnp.float32), faces)   # (B, F, 3, 3)

    x0 = face_verts[:, :, 0, 0]; y0 = face_verts[:, :, 0, 1]; z0 = face_verts[:, :, 0, 2]
    x1 = face_verts[:, :, 1, 0]; y1 = face_verts[:, :, 1, 1]; z1 = face_verts[:, :, 1, 2]
    x2 = face_verts[:, :, 2, 0]; y2 = face_verts[:, :, 2, 1]; z2 = face_verts[:, :, 2, 2]

    area = (x1 - x0) * (y2 - y0) - (y1 - y0) * (x2 - x0)
    ok = jnp.abs(area) > EPS
    inv = jnp.where(ok, 1.0 / jnp.where(ok, area, 1.0), 0.0)     # no inf/NaN

    # c0 = a0*px + b0*py + d0 (edge function / area); degenerate faces get d0=-1
    a0 = -(y2 - y1) * inv
    b0 = (x2 - x1) * inv
    d0 = jnp.where(ok, ((y2 - y1) * x1 - (x2 - x1) * y1) * inv, -1.0)
    a1 = -(y0 - y2) * inv
    b1 = (x0 - x2) * inv
    d1 = ((y0 - y2) * x2 - (x0 - x2) * y2) * inv
    geom = jnp.stack([a0, b0, d0, a1, b1, d1, z0 - z2, z1 - z2, z2], axis=-1)  # (B,F,9)

    # flat-normal diffuse shade, premultiplied into the vertex colors
    v0 = face_verts[:, :, 0, :]
    v1 = face_verts[:, :, 1, :]
    v2 = face_verts[:, :, 2, :]
    n = jnp.cross(v1 - v0, v2 - v0)
    inv_len = lax.rsqrt(jnp.sum(n * n, axis=-1) + 1e-12)
    ndotl = jnp.abs(jnp.einsum("bfc,c->bf", n, jnp.asarray(LIGHT, jnp.float32)) * inv_len)
    shade = AMBIENT + DIFFUSE * ndotl                            # (B, F), in [0.3, 1]
    P = face_cols * shade[:, :, None, None]                      # (B,F,3verts,3rgb) in [0,1]
    col = jnp.stack([P[:, :, 0, :] - P[:, :, 2, :],
                     P[:, :, 1, :] - P[:, :, 2, :],
                     P[:, :, 2, :]], axis=-1)                    # (B,F,3rgb,3): dX0,dX1,X2
    col = col.reshape(B, F, 9)

    coef = jnp.concatenate([geom, col], axis=-1)                 # (B, F, 18)
    if F_pad > F:
        # zero-padded faces give c0=c1=0, c2=1, zf=0 -> zf>0 fails -> never win
        coef = jnp.concatenate(
            [coef, jnp.zeros((B, F_pad - F, 18), jnp.float32)], axis=1)
    coef = coef.reshape(B, F_pad * 18)

    # NDC pixel-coordinate planes (PyTorch3D convention: +X left, +Y up)
    p = jnp.arange(R_pad * LANE, dtype=jnp.int32)
    px = 1.0 - 2.0 * ((p % W).astype(jnp.float32) + 0.5) / float(W)
    py = 1.0 - 2.0 * ((p // W).astype(jnp.float32) + 0.5) / float(H)
    pxy = jnp.stack([px, py], axis=0).reshape(2, R_pad, LANE)

    # ---- fused rasterize + shade kernel ---------------------------------------
    kernel = _make_render_kernel(TR, F_pad, unroll)
    images_cf = pl.pallas_call(
        kernel,
        grid=(B, num_tiles),
        in_specs=[
            pl.BlockSpec(memory_space=pltpu.MemorySpace.SMEM),          # coef (scalars)
            pl.BlockSpec((2, TR, LANE), lambda b, t: (0, t, 0)),        # px/py tile
        ],
        out_specs=pl.BlockSpec((1, 4, TR, LANE), lambda b, t: (b, 0, t, 0)),
        out_shape=jax.ShapeDtypeStruct((B, 4, R_pad, LANE), jnp.float32),
        compiler_params=pltpu.CompilerParams(
            dimension_semantics=("parallel", "parallel")),
    )(coef, pxy)

    # kernel output is channel-first & lane-dense; slice off the pixel padding
    # and match PyTorch3D's (N, H, W, 4) RGBA.
    # TODO(synk): for large images keep channel-first downstream; this transpose
    # is an extra HBM round-trip in XLA (irrelevant at 16x16).
    img = images_cf.reshape(B, 4, R_pad * LANE)[:, :, :HW].reshape(B, 4, H, W)
    return jnp.transpose(img, (0, 2, 3, 1))


def _make_inputs(key, B, V, F):
    k1, k2, k3, k4 = jax.random.split(key, 4)
    xy = jax.random.uniform(k1, (B, V, 2), jnp.float32, -0.9, 0.9)
    z = jax.random.uniform(k2, (B, V, 1), jnp.float32, 0.5, 2.0)
    verts = jnp.concatenate([xy, z], axis=-1)                     # (B, V, 3)
    faces = jax.random.randint(k3, (B, F, 3), 0, V, jnp.int32)    # (B, F, 3)
    vert_colors = jax.random.uniform(k4, (B, V, 3), jnp.float32)  # (B, V, 3)
    return verts, faces, vert_colors


if __name__ == "__main__":
    key0, key1 = jax.random.split(jax.random.PRNGKey(0))

    # Main case: B=2, 8 verts, 4 faces, 16x16 image (fully unrolled face loop).
    B, V, F, IMG = 2, 8, 4, 16
    verts, faces, vert_colors = _make_inputs(key0, B, V, F)
    images = jax.block_until_ready(mesh_renderer(verts, faces, vert_colors, image_size=IMG))
    assert images.shape == (B, IMG, IMG, 4), images.shape
    assert images.dtype == jnp.float32
    assert bool(jnp.all(jnp.isfinite(images)))
    assert bool(jnp.all(images[..., 3] == 1.0))      # hard_rgb_blend alpha

    # Second case exercises the F>16 partially-unrolled loop and pixel padding
    # (12*12 = 144 pixels is not a multiple of 128).
    B2, V2, F2, IMG2 = 1, 12, 24, 12
    verts2, faces2, colors2 = _make_inputs(key1, B2, V2, F2)
    images2 = jax.block_until_ready(mesh_renderer(verts2, faces2, colors2, image_size=IMG2))
    assert images2.shape == (B2, IMG2, IMG2, 4), images2.shape
    assert bool(jnp.all(jnp.isfinite(images2)))

    # TODO(synk): blur_radius > 0 soft rasterization / faces_per_pixel > 1 /
    # perspective-correct barycentrics not implemented.
    print("KERNEL_OK")
</pallas_src>

<mosaic_0001>
module attributes {stable_mosaic.version = 11 : i64} {
  func.func @kernel(%arg0: i32, %arg1: i32, %arg2: memref<2x72xf32, #tpu.memory_space<smem>>, %arg3: memref<2x8x128xf32, #tpu.memory_space<vmem>>, %arg4: memref<1x4x8x128xf32, #tpu.memory_space<vmem>>) attributes {dimension_semantics = [#tpu.dimension_semantics<parallel>, #tpu.dimension_semantics<parallel>], iteration_bounds = array<i64: 2, 1>, scalar_prefetch = 0 : i64, scratch_operands = 0 : i64, tpu.core_type = #tpu.core_type<tc>, window_params = [{transform_indices = @transform_0, window_bounds = array<i64: 2, 72>}, {transform_indices = @transform_1, window_bounds = array<i64: 2, 8, 128>}, {transform_indices = @transform_2, window_bounds = array<i64: 1, 4, 8, 128>}]} {
    %c0 = arith.constant 0 : index
    %c0_0 = arith.constant 0 : index
    %c0_1 = arith.constant 0 : index
    %0 = vector.load %arg3[%c0, %c0_0, %c0_1] : memref<2x8x128xf32, #tpu.memory_space<vmem>>, vector<1x8x128xf32>
    %1 = vector.shape_cast %0 : vector<1x8x128xf32> to vector<8x128xf32>
    %c1 = arith.constant 1 : index
    %c0_2 = arith.constant 0 : index
    %c0_3 = arith.constant 0 : index
    %2 = vector.load %arg3[%c1, %c0_2, %c0_3] : memref<2x8x128xf32, #tpu.memory_space<vmem>>, vector<1x8x128xf32>
    %3 = vector.shape_cast %2 : vector<1x8x128xf32> to vector<8x128xf32>
    %cst = arith.constant 1.000000e+10 : f32
    %4 = vector.broadcast %cst : f32 to vector<8x128xf32>
    %cst_4 = arith.constant 1.000000e+00 : f32
    %5 = vector.broadcast %cst_4 : f32 to vector<8x128xf32>
    %cst_5 = arith.constant 1.000000e+00 : f32
    %6 = vector.broadcast %cst_5 : f32 to vector<8x128xf32>
    %cst_6 = arith.constant 1.000000e+00 : f32
    %7 = vector.broadcast %cst_6 : f32 to vector<8x128xf32>
    %c0_i32 = arith.constant 0 : i32
    %c18_i32 = arith.constant 18 : i32
    %8 = arith.muli %c0_i32, %c18_i32 : i32
    %c0_i32_7 = arith.constant 0 : i32
    %9 = arith.addi %8, %c0_i32_7 : i32
    %10 = arith.index_cast %arg0 : i32 to index
    %11 = arith.index_cast %9 : i32 to index
    %12 = memref.load %arg2[%10, %11] : memref<2x72xf32, #tpu.memory_space<smem>>
    %c1_i32 = arith.constant 1 : i32
    %13 = arith.addi %8, %c1_i32 : i32
    %14 = arith.index_cast %arg0 : i32 to index
    %15 = arith.index_cast %13 : i32 to index
    %16 = memref.load %arg2[%14, %15] : memref<2x72xf32, #tpu.memory_space<smem>>
    %c2_i32 = arith.constant 2 : i32
    %17 = arith.addi %8, %c2_i32 : i32
    %18 = arith.index_cast %arg0 : i32 to index
    %19 = arith.index_cast %17 : i32 to index
    %20 = memref.load %arg2[%18, %19] : memref<2x72xf32, #tpu.memory_space<smem>>
    %c3_i32 = arith.constant 3 : i32
    %21 = arith.addi %8, %c3_i32 : i32
    %22 = arith.index_cast %arg0 : i32 to index
    %23 = arith.index_cast %21 : i32 to index
    %24 = memref.load %arg2[%22, %23] : memref<2x72xf32, #tpu.memory_space<smem>>
    %c4_i32 = arith.constant 4 : i32
    %25 = arith.addi %8, %c4_i32 : i32
    %26 = arith.index_cast %arg0 : i32 to index
    %27 = arith.index_cast %25 : i32 to index
    %28 = memref.load %arg2[%26, %27] : memref<2x72xf32, #tpu.memory_space<smem>>
    %c5_i32 = arith.constant 5 : i32
    %29 = arith.addi %8, %c5_i32 : i32
    %30 = arith.index_cast %arg0 : i32 to index
    %31 = arith.index_cast %29 : i32 to index
    %32 = memref.load %arg2[%30, %31] : memref<2x72xf32, #tpu.memory_space<smem>>
    %c6_i32 = arith.constant 6 : i32
    %33 = arith.addi %8, %c6_i32 : i32
    %34 = arith.index_cast %arg0 : i32 to index
    %35 = arith.index_cast %33 : i32 to index
    %36 = memref.load %arg2[%34, %35] : memref<2x72xf32, #tpu.memory_space<smem>>
    %c7_i32 = arith.constant 7 : i32
    %37 = arith.addi %8, %c7_i32 : i32
    %38 = arith.index_cast %arg0 : i32 to index
    %39 = arith.index_cast %37 : i32 to index
    %40 = memref.load %arg2[%38, %39] : memref<2x72xf32, #tpu.memory_space<smem>>
    %c8_i32 = arith.constant 8 : i32
    %41 = arith.addi %8, %c8_i32 : i32
    %42 = arith.index_cast %arg0 : i32 to index
    %43 = arith.index_cast %41 : i32 to index
    %44 = memref.load %arg2[%42, %43] : memref<2x72xf32, #tpu.memory_space<smem>>
    %c9_i32 = arith.constant 9 : i32
    %45 = arith.addi %8, %c9_i32 : i32
    %46 = arith.index_cast %arg0 : i32 to index
    %47 = arith.index_cast %45 : i32 to index
    %48 = memref.load %arg2[%46, %47] : memref<2x72xf32, #tpu.memory_space<smem>>
    %c10_i32 = arith.constant 10 : i32
    %49 = arith.addi %8, %c10_i32 : i32
    %50 = arith.index_cast %arg0 : i32 to index
    %51 = arith.index_cast %49 : i32 to index
    %52 = memref.load %arg2[%50, %51] : memref<2x72xf32, #tpu.memory_space<smem>>
    %c11_i32 = arith.constant 11 : i32
    %53 = arith.addi %8, %c11_i32 : i32
    %54 = arith.index_cast %arg0 : i32 to index
    %55 = arith.index_cast %53 : i32 to index
    %56 = memref.load %arg2[%54, %55] : memref<2x72xf32, #tpu.memory_space<smem>>
    %c12_i32 = arith.constant 12 : i32
    %57 = arith.addi %8, %c12_i32 : i32
    %58 = arith.index_cast %arg0 : i32 to index
    %59 = arith.index_cast %57 : i32 to index
    %60 = memref.load %arg2[%58, %59] : memref<2x72xf32, #tpu.memory_space<smem>>
    %c13_i32 = arith.constant 13 : i32
    %61 = arith.addi %8, %c13_i32 : i32
    %62 = arith.index_cast %arg0 : i32 to index
    %63 = arith.index_cast %61 : i32 to index
    %64 = memref.load %arg2[%62, %63] : memref<2x72xf32, #tpu.memory_space<smem>>
    %c14_i32 = arith.constant 14 : i32
    %65 = arith.addi %8, %c14_i32 : i32
    %66 = arith.index_cast %arg0 : i32 to index
    %67 = arith.index_cast %65 : i32 to index
    %68 = memref.load %arg2[%66, %67] : memref<2x72xf32, #tpu.memory_space<smem>>
    %c15_i32 = arith.constant 15 : i32
    %69 = arith.addi %8, %c15_i32 : i32
    %70 = arith.index_cast %arg0 : i32 to index
    %71 = arith.index_cast %69 : i32 to index
    %72 = memref.load %arg2[%70, %71] : memref<2x72xf32, #tpu.memory_space<smem>>
    %c16_i32 = arith.constant 16 : i32
    %73 = arith.addi %8, %c16_i32 : i32
    %74 = arith.index_cast %arg0 : i32 to index
    %75 = arith.index_cast %73 : i32 to index
    %76 = memref.load %arg2[%74, %75] : memref<2x72xf32, #tpu.memory_space<smem>>
    %c17_i32 = arith.constant 17 : i32
    %77 = arith.addi %8, %c17_i32 : i32
    %78 = arith.index_cast %arg0 : i32 to index
    %79 = arith.index_cast %77 : i32 to index
    %80 = memref.load %arg2[%78, %79] : memref<2x72xf32, #tpu.memory_space<smem>>
    %81 = vector.broadcast %12 : f32 to vector<8x128xf32>
    %82 = arith.mulf %81, %1 : vector<8x128xf32>
    %83 = vector.broadcast %16 : f32 to vector<8x128xf32>
    %84 = arith.mulf %83, %3 : vector<8x128xf32>
    %85 = arith.addf %82, %84 : vector<8x128xf32>
    %86 = vector.broadcast %20 : f32 to vector<8x128xf32>
    %87 = arith.addf %85, %86 : vector<8x128xf32>
    %88 = vector.broadcast %24 : f32 to vector<8x128xf32>
    %89 = arith.mulf %88, %1 : vector<8x128xf32>
    %90 = vector.broadcast %28 : f32 to vector<8x128xf32>
    %91 = arith.mulf %90, %3 : vector<8x128xf32>
    %92 = arith.addf %89, %91 : vector<8x128xf32>
    %93 = vector.broadcast %32 : f32 to vector<8x128xf32>
    %94 = arith.addf %92, %93 : vector<8x128xf32>
    %cst_8 = arith.constant 1.000000e+00 : f32
    %95 = vector.broadcast %cst_8 : f32 to vector<8x128xf32>
    %96 = arith.subf %95, %87 : vector<8x128xf32>
    %97 = arith.subf %96, %94 : vector<8x128xf32>
    %98 = vector.broadcast %36 : f32 to vector<8x128xf32>
    %99 = arith.mulf %87, %98 : vector<8x128xf32>
    %100 = vector.broadcast %44 : f32 to vector<8x128xf32>
    %101 = arith.addf %100, %99 : vector<8x128xf32>
    %102 = vector.broadcast %40 : f32 to vector<8x128xf32>
    %103 = arith.mulf %94, %102 : vector<8x128xf32>
    %104 = arith.addf %101, %103 : vector<8x128xf32>
    %105 = arith.minimumf %87, %94 : vector<8x128xf32>
    %106 = arith.minimumf %105, %97 : vector<8x128xf32>
    %cst_9 = arith.constant 0.000000e+00 : f32
    %107 = vector.broadcast %cst_9 : f32 to vector<8x128xf32>
    %108 = arith.cmpf oge, %106, %107 : vector<8x128xf32>
    %cst_10 = arith.constant 0.000000e+00 : f32
    %109 = vector.broadcast %cst_10 : f32 to vector<8x128xf32>
    %110 = arith.cmpf ogt, %104, %109 : vector<8x128xf32>
    %111 = arith.andi %108, %110 : vector<8x128xi1>
    %112 = arith.cmpf olt, %104, %4 : vector<8x128xf32>
    %113 = arith.andi %111, %112 : vector<8x128xi1>
    %114 = vector.broadcast %48 : f32 to vector<8x128xf32>
    %115 = arith.mulf %87, %114 : vector<8x128xf32>
    %116 = vector.broadcast %56 : f32 to vector<8x128xf32>
    %117 = arith.addf %116, %115 : vector<8x128xf32>
    %118 = vector.broadcast %52 : f32 to vector<8x128xf32>
    %119 = arith.mulf %94, %118 : vector<8x128xf32>
    %120 = arith.addf %117, %119 : vector<8x128xf32>
    %121 = vector.broadcast %60 : f32 to vector<8x128xf32>
    %122 = arith.mulf %87, %121 : vector<8x128xf32>
    %123 = vector.broadcast %68 : f32 to vector<8x128xf32>
    %124 = arith.addf %123, %122 : vector<8x128xf32>
    %125 = vector.broadcast %64 : f32 to vector<8x128xf32>
    %126 = arith.mulf %94, %125 : vector<8x128xf32>
    %127 = arith.addf %124, %126 : vector<8x128xf32>
    %128 = vector.broadcast %72 : f32 to vector<8x128xf32>
    %129 = arith.mulf %87, %128 : vector<8x128xf32>
    %130 = vector.broadcast %80 : f32 to vector<8x128xf32>
    %131 = arith.addf %130, %129 : vector<8x128xf32>
    %132 = vector.broadcast %76 : f32 to vector<8x128xf32>
    %133 = arith.mulf %94, %132 : vector<8x128xf32>
    %134 = arith.addf %131, %133 : vector<8x128xf32>
    %135 = arith.select %113, %104, %4 : vector<8x128xi1>, vector<8x128xf32>
    %136 = arith.select %113, %120, %5 : vector<8x128xi1>, vector<8x128xf32>
    %137 = arith.select %113, %127, %6 : vector<8x128xi1>, vector<8x128xf32>
    %138 = arith.select %113, %134, %7 : vector<8x128xi1>, vector<8x128xf32>
    %c1_i32_11 = arith.constant 1 : i32
    %c18_i32_12 = arith.constant 18 : i32
    %139 = arith.muli %c1_i32_11, %c18_i32_12 : i32
    %c0_i32_13 = arith.constant 0 : i32
    %140 = arith.addi %139, %c0_i32_13 : i32
    %141 = arith.index_cast %arg0 : i32 to index
    %142 = arith.index_cast %140 : i32 to index
    %143 = memref.load %arg2[%141, %142] : memref<2x72xf32, #tpu.memory_space<smem>>
    %c1_i32_14 = arith.constant 1 : i32
    %144 = arith.addi %139, %c1_i32_14 : i32
    %145 = arith.index_cast %arg0 : i32 to index
    %146 = arith.index_cast %144 : i32 to index
    %147 = memref.load %arg2[%145, %146] : memref<2x72xf32, #tpu.memory_space<smem>>
    %c2_i32_15 = arith.constant 2 : i32
    %148 = arith.addi %139, %c2_i32_15 : i32
    %149 = arith.index_cast %arg0 : i32 to index
    %150 = arith.index_cast %148 : i32 to index
    %151 = memref.load %arg2[%149, %150] : memref<2x72xf32, #tpu.memory_space<smem>>
    %c3_i32_16 = arith.constant 3 : i32
    %152 = arith.addi %139, %c3_i32_16 : i32
    %153 = arith.index_cast %arg0 : i32 to index
    %154 = arith.index_cast %152 : i32 to index
    %155 = memref.load %arg2[%153, %154] : memref<2x72xf32, #tpu.memory_space<smem>>
    %c4_i32_17 = arith.constant 4 : i32
    %156 = arith.addi %139, %c4_i32_17 : i32
    %157 = arith.index_cast %arg0 : i32 to index
    %158 = arith.index_cast %156 : i32 to index
    %159 = memref.load %arg2[%157, %158] : memref<2x72xf32, #tpu.memory_space<smem>>
    %c5_i32_18 = arith.constant 5 : i32
    %160 = arith.addi %139, %c5_i32_18 : i32
    %161 = arith.index_cast %arg0 : i32 to index
    %162 = arith.index_cast %160 : i32 to index
    %163 = memref.load %arg2[%161, %162] : memref<2x72xf32, #tpu.memory_space<smem>>
    %c6_i32_19 = arith.constant 6 : i32
    %164 = arith.addi %139, %c6_i32_19 : i32
    %165 = arith.index_cast %arg0 : i32 to index
    %166 = arith.index_cast %164 : i32 to index
    %167 = memref.load %arg2[%165, %166] : memref<2x72xf32, #tpu.memory_space<smem>>
    %c7_i32_20 = arith.constant 7 : i32
    %168 = arith.addi %139, %c7_i32_20 : i32
    %169 = arith.index_cast %arg0 : i32 to index
    %170 = arith.index_cast %168 : i32 to index
    %171 = memref.load %arg2[%169, %170] : memref<2x72xf32, #tpu.memory_space<smem>>
    %c8_i32_21 = arith.constant 8 : i32
    %172 = arith.addi %139, %c8_i32_21 : i32
    %173 = arith.index_cast %arg0 : i32 to index
    %174 = arith.index_cast %172 : i32 to index
    %175 = memref.load %arg2[%173, %174] : memref<2x72xf32, #tpu.memory_space<smem>>
    %c9_i32_22 = arith.constant 9 : i32
    %176 = arith.addi %139, %c9_i32_22 : i32
    %177 = arith.index_cast %arg0 : i32 to index
    %178 = arith.index_cast %176 : i32 to index
    %179 = memref.load %arg2[%177, %178] : memref<2x72xf32, #tpu.memory_space<smem>>
    %c10_i32_23 = arith.constant 10 : i32
    %180 = arith.addi %139, %c10_i32_23 : i32
    %181 = arith.index_cast %arg0 : i32 to index
    %182 = arith.index_cast %180 : i32 to index
    %183 = memref.load %arg2[%181, %182] : memref<2x72xf32, #tpu.memory_space<smem>>
    %c11_i32_24 = arith.constant 11 : i32
    %184 = arith.addi %139, %c11_i32_24 : i32
    %185 = arith.index_cast %arg0 : i32 to index
    %186 = arith.index_cast %184 : i32 to index
    %187 = memref.load %arg2[%185, %186] : memref<2x72xf32, #tpu.memory_space<smem>>
    %c12_i32_25 = arith.constant 12 : i32
    %188 = arith.addi %139, %c12_i32_25 : i32
    %189 = arith.index_cast %arg0 : i32 to index
    %190 = arith.index_cast %188 : i32 to index
    %191 = memref.load %arg2[%189, %190] : memref<2x72xf32, #tpu.memory_space<smem>>
    %c13_i32_26 = arith.constant 13 : i32
    %192 = arith.addi %139, %c13_i32_26 : i32
    %193 = arith.index_cast %arg0 : i32 to index
    %194 = arith.index_cast %192 : i32 to index
    %195 = memref.load %arg2[%193, %194] : memref<2x72xf32, #tpu.memory_space<smem>>
    %c14_i32_27 = arith.constant 14 : i32
    %196 = arith.addi %139, %c14_i32_27 : i32
    %197 = arith.index_cast %arg0 : i32 to index
    %198 = arith.index_cast %196 : i32 to index
    %199 = memref.load %arg2[%197, %198] : memref<2x72xf32, #tpu.memory_space<smem>>
    %c15_i32_28 = arith.constant 15 : i32
    %200 = arith.addi %139, %c15_i32_28 : i32
    %201 = arith.index_cast %arg0 : i32 to index
    %202 = arith.index_cast %200 : i32 to index
    %203 = memref.load %arg2[%201, %202] : memref<2x72xf32, #tpu.memory_space<smem>>
    %c16_i32_29 = arith.constant 16 : i32
    %204 = arith.addi %139, %c16_i32_29 : i32
    %205 = arith.index_cast %arg0 : i32 to index
    %206 = arith.index_cast %204 : i32 to index
    %207 = memref.load %arg2[%205, %206] : memref<2x72xf32, #tpu.memory_space<smem>>
    %c17_i32_30 = arith.constant 17 : i32
    %208 = arith.addi %139, %c17_i32_30 : i32
    %209 = arith.index_cast %arg0 : i32 to index
    %210 = arith.index_cast %208 : i32 to index
    %211 = memref.load %arg2[%209, %210] : memref<2x72xf32, #tpu.memory_space<smem>>
    %212 = vector.broadcast %143 : f32 to vector<8x128xf32>
    %213 = arith.mulf %212, %1 : vector<8x128xf32>
    %214 = vector.broadcast %147 : f32 to vector<8x128xf32>
    %215 = arith.mulf %214, %3 : vector<8x128xf32>
    %216 = arith.addf %213, %215 : vector<8x128xf32>
    %217 = vector.broadcast %151 : f32 to vector<8x128xf32>
    %218 = arith.addf %216, %217 : vector<8x128xf32>
    %219 = vector.broadcast %155 : f32 to vector<8x128xf32>
    %220 = arith.mulf %219, %1 : vector<8x128xf32>
    %221 = vector.broadcast %159 : f32 to vector<8x128xf32>
    %222 = arith.mulf %221, %3 : vector<8x128xf32>
    %223 = arith.addf %220, %222 : vector<8x128xf32>
    %224 = vector.broadcast %163 : f32 to vector<8x128xf32>
    %225 = arith.addf %223, %224 : vector<8x128xf32>
    %cst_31 = arith.constant 1.000000e+00 : f32
    %226 = vector.broadcast %cst_31 : f32 to vector<8x128xf32>
    %227 = arith.subf %226, %218 : vector<8x128xf32>
    %228 = arith.subf %227, %225 : vector<8x128xf32>
    %229 = vector.broadcast %167 : f32 to vector<8x128xf32>
    %230 = arith.mulf %218, %229 : vector<8x128xf32>
    %231 = vector.broadcast %175 : f32 to vector<8x128xf32>
    %232 = arith.addf %231, %230 : vector<8x128xf32>
    %233 = vector.broadcast %171 : f32 to vector<8x128xf32>
    %234 = arith.mulf %225, %233 : vector<8x128xf32>
    %235 = arith.addf %232, %234 : vector<8x128xf32>
    %236 = arith.minimumf %218, %225 : vector<8x128xf32>
    %237 = arith.minimumf %236, %228 : vector<8x128xf32>
    %cst_32 = arith.constant 0.000000e+00 : f32
    %238 = vector.broadcast %cst_32 : f32 to vector<8x128xf32>
    %239 = arith.cmpf oge, %237, %238 : vector<8x128xf32>
    %cst_33 = arith.constant 0.000000e+00 : f32
    %240 = vector.broadcast %cst_33 : f32 to vector<8x128xf32>
    %241 = arith.cmpf ogt, %235, %240 : vector<8x128xf32>
    %242 = arith.andi %239, %241 : vector<8x128xi1>
    %243 = arith.cmpf olt, %235, %135 : vector<8x128xf32>
    %244 = arith.andi %242, %243 : vector<8x128xi1>
    %245 = vector.broadcast %179 : f32 to vector<8x128xf32>
    %246 = arith.mulf %218, %245 : vector<8x128xf32>
    %247 = vector.broadcast %187 : f32 to vector<8x128xf32>
    %248 = arith.addf %247, %246 : vector<8x128xf32>
    %249 = vector.broadcast %183 : f32 to vector<8x128xf32>
    %250 = arith.mulf %225, %249 : vector<8x128xf32>
    %251 = arith.addf %248, %250 : vector<8x128xf32>
    %252 = vector.broadcast %191 : f32 to vector<8x128xf32>
    %253 = arith.mulf %218, %252 : vector<8x128xf32>
    %254 = vector.broadcast %199 : f32 to vector<8x128xf32>
    %255 = arith.addf %254, %253 : vector<8x128xf32>
    %256 = vector.broadcast %195 : f32 to vector<8x128xf32>
    %257 = arith.mulf %225, %256 : vector<8x128xf32>
    %258 = arith.addf %255, %257 : vector<8x128xf32>
    %259 = vector.broadcast %203 : f32 to vector<8x128xf32>
    %260 = arith.mulf %218, %259 : vector<8x128xf32>
    %261 = vector.broadcast %211 : f32 to vector<8x128xf32>
    %262 = arith.addf %261, %260 : vector<8x128xf32>
    %263 = vector.broadcast %207 : f32 to vector<8x128xf32>
    %264 = arith.mulf %225, %263 : vector<8x128xf32>
    %265 = arith.addf %262, %264 : vector<8x128xf32>
    %266 = arith.select %244, %235, %135 : vector<8x128xi1>, vector<8x128xf32>
    %267 = arith.select %244, %251, %136 : vector<8x128xi1>, vector<8x128xf32>
    %268 = arith.select %244, %258, %137 : vector<8x128xi1>, vector<8x128xf32>
    %269 = arith.select %244, %265, %138 : vector<8x128xi1>, vector<8x128xf32>
    %c2_i32_34 = arith.constant 2 : i32
    %c18_i32_35 = arith.constant 18 : i32
    %270 = arith.muli %c2_i32_34, %c18_i32_35 : i32
    %c0_i32_36 = arith.constant 0 : i32
    %271 = arith.addi %270, %c0_i32_36 : i32
    %272 = arith.index_cast %arg0 : i32 to index
    %273 = arith.index_cast %271 : i32 to index
    %274 = memref.load %arg2[%272, %273] : memref<2x72xf32, #tpu.memory_space<smem>>
    %c1_i32_37 = arith.constant 1 : i32
    %275 = arith.addi %270, %c1_i32_37 : i32
    %276 = arith.index_cast %arg0 : i32 to index
    %277 = arith.index_cast %275 : i32 to index
    %278 = memref.load %arg2[%276, %277] : memref<2x72xf32, #tpu.memory_space<smem>>
    %c2_i32_38 = arith.constant 2 : i32
    %279 = arith.addi %270, %c2_i32_38 : i32
    %280 = arith.index_cast %arg0 : i32 to index
    %281 = arith.index_cast %279 : i32 to index
    %282 = memref.load %arg2[%280, %281] : memref<2x72xf32, #tpu.memory_space<smem>>
    %c3_i32_39 = arith.constant 3 : i32
    %283 = arith.addi %270, %c3_i32_39 : i32
    %284 = arith.index_cast %arg0 : i32 to index
    %285 = arith.index_cast %283 : i32 to index
    %286 = memref.load %arg2[%284, %285] : memref<2x72xf32, #tpu.memory_space<smem>>
    %c4_i32_40 = arith.constant 4 : i32
    %287 = arith.addi %270, %c4_i32_40 : i32
    %288 = arith.index_cast %arg0 : i32 to index
    %289 = arith.index_cast %287 : i32 to index
    %290 = memref.load %arg2[%288, %289] : memref<2x72xf32, #tpu.memory_space<smem>>
    %c5_i32_41 = arith.constant 5 : i32
    %291 = arith.addi %270, %c5_i32_41 : i32
    %292 = arith.index_cast %arg0 : i32 to index
    %293 = arith.index_cast %291 : i32 to index
    %294 = memref.load %arg2[%292, %293] : memref<2x72xf32, #tpu.memory_space<smem>>
    %c6_i32_42 = arith.constant 6 : i32
    %295 = arith.addi %270, %c6_i32_42 : i32
    %296 = arith.index_cast %arg0 : i32 to index
    %297 = arith.index_cast %295 : i32 to index
    %298 = memref.load %arg2[%296, %297] : memref<2x72xf32, #tpu.memory_space<smem>>
    %c7_i32_43 = arith.constant 7 : i32
    %299 = arith.addi %270, %c7_i32_43 : i32
    %300 = arith.index_cast %arg0 : i32 to index
    %301 = arith.index_cast %299 : i32 to index
    %302 = memref.load %arg2[%300, %301] : memref<2x72xf32, #tpu.memory_space<smem>>
    %c8_i32_44 = arith.constant 8 : i32
    %303 = arith.addi %270, %c8_i32_44 : i32
    %304 = arith.index_cast %arg0 : i32 to index
    %305 = arith.index_cast %303 : i32 to index
    %306 = memref.load %arg2[%304, %305] : memref<2x72xf32, #tpu.memory_space<smem>>
    %c9_i32_45 = arith.constant 9 : i32
    %307 = arith.addi %270, %c9_i32_45 : i32
    %308 = arith.index_cast %arg0 : i32 to index
    %309 = arith.index_cast %307 : i32 to index
    %310 = memref.load %arg2[%308, %309] : memref<2x72xf32, #tpu.memory_space<smem>>
    %c10_i32_46 = arith.constant 10 : i32
    %311 = arith.addi %270, %c10_i32_46 : i32
    %312 = arith.index_cast %arg0 : i32 to index
    %313 = arith.index_cast %311 : i32 to index
    %314 = memref.load %arg2[%312, %313] : memref<2x72xf32, #tpu.memory_space<smem>>
    %c11_i32_47 = arith.constant 11 : i32
    %315 = arith.addi %270, %c11_i32_47 : i32
    %316 = arith.index_cast %arg0 : i32 to index
    %317 = arith.index_cast %315 : i32 to index
    %318 = memref.load %arg2[%316, %317] : memref<2x72xf32, #tpu.memory_space<smem>>
    %c12_i32_48 = arith.constant 12 : i32
    %319 = arith.addi %270, %c12_i32_48 : i32
    %320 = arith.index_cast %arg0 : i32 to index
    %321 = arith.index_cast %319 : i32 to index
    %322 = memref.load %arg2[%320, %321] : memref<2x72xf32, #tpu.memory_space<smem>>
    %c13_i32_49 = arith.constant 13 : i32
    %323 = arith.addi %270, %c13_i32_49 : i32
    %324 = arith.index_cast %arg0 : i32 to index
    %325 = arith.index_cast %323 : i32 to index
    %326 = memref.load %arg2[%324, %325] : memref<2x72xf32, #tpu.memory_space<smem>>
    %c14_i32_50 = arith.constant 14 : i32
    %327 = arith.addi %270, %c14_i32_50 : i32
    %328 = arith.index_cast %arg0 : i32 to index
    %329 = arith.index_cast %327 : i32 to index
    %330 = memref.load %arg2[%328, %329] : memref<2x72xf32, #tpu.memory_space<smem>>
    %c15_i32_51 = arith.constant 15 : i32
    %331 = arith.addi %270, %c15_i32_51 : i32
    %332 = arith.index_cast %arg0 : i32 to index
    %333 = arith.index_cast %331 : i32 to index
    %334 = memref.load %arg2[%332, %333] : memref<2x72xf32, #tpu.memory_space<smem>>
    %c16_i32_52 = arith.constant 16 : i32
    %335 = arith.addi %270, %c16_i32_52 : i32
    %336 = arith.index_cast %arg0 : i32 to index
    %337 = arith.index_cast %335 : i32 to index
    %338 = memref.load %arg2[%336, %337] : memref<2x72xf32, #tpu.memory_space<smem>>
    %c17_i32_53 = arith.constant 17 : i32
    %339 = arith.addi %270, %c17_i32_53 : i32
    %340 = arith.index_cast %arg0 : i32 to index
    %341 = arith.index_cast %339 : i32 to index
    %342 = memref.load %arg2[%340, %341] : memref<2x72xf32, #tpu.memory_space<smem>>
    %343 = vector.broadcast %274 : f32 to vector<8x128xf32>
    %344 = arith.mulf %343, %1 : vector<8x128xf32>
    %345 = vector.broadcast %278 : f32 to vector<8x128xf32>
    %346 = arith.mulf %345, %3 : vector<8x128xf32>
    %347 = arith.addf %344, %346 : vector<8x128xf32>
    %348 = vector.broadcast %282 : f32 to vector<8x128xf32>
    %349 = arith.addf %347, %348 : vector<8x128xf32>
    %350 = vector.broadcast %286 : f32 to vector<8x128xf32>
    %351 = arith.mulf %350, %1 : vector<8x128xf32>
    %352 = vector.broadcast %290 : f32 to vector<8x128xf32>
    %353 = arith.mulf %352, %3 : vector<8x128xf32>
    %354 = arith.addf %351, %353 : vector<8x128xf32>
    %355 = vector.broadcast %294 : f32 to vector<8x128xf32>
    %356 = arith.addf %354, %355 : vector<8x128xf32>
    %cst_54 = arith.constant 1.000000e+00 : f32
    %357 = vector.broadcast %cst_54 : f32 to vector<8x128xf32>
    %358 = arith.subf %357, %349 : vector<8x128xf32>
    %359 = arith.subf %358, %356 : vector<8x128xf32>
    %360 = vector.broadcast %298 : f32 to vector<8x128xf32>
    %361 = arith.mulf %349, %360 : vector<8x128xf32>
    %362 = vector.broadcast %306 : f32 to vector<8x128xf32>
    %363 = arith.addf %362, %361 : vector<8x128xf32>
    %364 = vector.broadcast %302 : f32 to vector<8x128xf32>
    %365 = arith.mulf %356, %364 : vector<8x128xf32>
    %366 = arith.addf %363, %365 : vector<8x128xf32>
    %367 = arith.minimumf %349, %356 : vector<8x128xf32>
    %368 = arith.minimumf %367, %359 : vector<8x128xf32>
    %cst_55 = arith.constant 0.000000e+00 : f32
    %369 = vector.broadcast %cst_55 : f32 to vector<8x128xf32>
    %370 = arith.cmpf oge, %368, %369 : vector<8x128xf32>
    %cst_56 = arith.constant 0.000000e+00 : f32
    %371 = vector.broadcast %cst_56 : f32 to vector<8x128xf32>
    %372 = arith.cmpf ogt, %366, %371 : vector<8x128xf32>
    %373 = arith.andi %370, %372 : vector<8x128xi1>
    %374 = arith.cmpf olt, %366, %266 : vector<8x128xf32>
    %375 = arith.andi %373, %374 : vector<8x128xi1>
    %376 = vector.broadcast %310 : f32 to vector<8x128xf32>
    %377 = arith.mulf %349, %376 : vector<8x128xf32>
    %378 = vector.broadcast %318 : f32 to vector<8x128xf32>
    %379 = arith.addf %378, %377 : vector<8x128xf32>
    %380 = vector.broadcast %314 : f32 to vector<8x128xf32>
    %381 = arith.mulf %356, %380 : vector<8x128xf32>
    %382 = arith.addf %379, %381 : vector<8x128xf32>
    %383 = vector.broadcast %322 : f32 to vector<8x128xf32>
    %384 = arith.mulf %349, %383 : vector<8x128xf32>
    %385 = vector.broadcast %330 : f32 to vector<8x128xf32>
    %386 = arith.addf %385, %384 : vector<8x128xf32>
    %387 = vector.broadcast %326 : f32 to vector<8x128xf32>
    %388 = arith.mulf %356, %387 : vector<8x128xf32>
    %389 = arith.addf %386, %388 : vector<8x128xf32>
    %390 = vector.broadcast %334 : f32 to vector<8x128xf32>
    %391 = arith.mulf %349, %390 : vector<8x128xf32>
    %392 = vector.broadcast %342 : f32 to vector<8x128xf32>
    %393 = arith.addf %392, %391 : vector<8x128xf32>
    %394 = vector.broadcast %338 : f32 to vector<8x128xf32>
    %395 = arith.mulf %356, %394 : vector<8x128xf32>
    %396 = arith.addf %393, %395 : vector<8x128xf32>
    %397 = arith.select %375, %366, %266 : vector<8x128xi1>, vector<8x128xf32>
    %398 = arith.select %375, %382, %267 : vector<8x128xi1>, vector<8x128xf32>
    %399 = arith.select %375, %389, %268 : vector<8x128xi1>, vector<8x128xf32>
    %400 = arith.select %375, %396, %269 : vector<8x128xi1>, vector<8x128xf32>
    %c3_i32_57 = arith.constant 3 : i32
    %c18_i32_58 = arith.constant 18 : i32
    %401 = arith.muli %c3_i32_57, %c18_i32_58 : i32
    %c0_i32_59 = arith.constant 0 : i32
    %402 = arith.addi %401, %c0_i32_59 : i32
    %403 = arith.index_cast %arg0 : i32 to index
    %404 = arith.index_cast %402 : i32 to index
    %405 = memref.load %arg2[%403, %404] : memref<2x72xf32, #tpu.memory_space<smem>>
    %c1_i32_60 = arith.constant 1 : i32
    %406 = arith.addi %401, %c1_i32_60 : i32
    %407 = arith.index_cast %arg0 : i32 to index
    %408 = arith.index_cast %406 : i32 to index
    %409 = memref.load %arg2[%407, %408] : memref<2x72xf32, #tpu.memory_space<smem>>
    %c2_i32_61 = arith.constant 2 : i32
    %410 = arith.addi %401, %c2_i32_61 : i32
    %411 = arith.index_cast %arg0 : i32 to index
    %412 = arith.index_cast %410 : i32 to index
    %413 = memref.load %arg2[%411, %412] : memref<2x72xf32, #tpu.memory_space<smem>>
    %c3_i32_62 = arith.constant 3 : i32
    %414 = arith.addi %401, %c3_i32_62 : i32
    %415 = arith.index_cast %arg0 : i32 to index
    %416 = arith.index_cast %414 : i32 to index
    %417 = memref.load %arg2[%415, %416] : memref<2x72xf32, #tpu.memory_space<smem>>
    %c4_i32_63 = arith.constant 4 : i32
    %418 = arith.addi %401, %c4_i32_63 : i32
    %419 = arith.index_cast %arg0 : i32 to index
    %420 = arith.index_cast %418 : i32 to index
    %421 = memref.load %arg2[%419, %420] : memref<2x72xf32, #tpu.memory_space<smem>>
    %c5_i32_64 = arith.constant 5 : i32
    %422 = arith.addi %401, %c5_i32_64 : i32
    %423 = arith.index_cast %arg0 : i32 to index
    %424 = arith.index_cast %422 : i32 to index
    %425 = memref.load %arg2[%423, %424] : memref<2x72xf32, #tpu.memory_space<smem>>
    %c6_i32_65 = arith.constant 6 : i32
    %426 = arith.addi %401, %c6_i32_65 : i32
    %427 = arith.index_cast %arg0 : i32 to index
    %428 = arith.index_cast %426 : i32 to index
    %429 = memref.load %arg2[%427, %428] : memref<2x72xf32, #tpu.memory_space<smem>>
    %c7_i32_66 = arith.constant 7 : i32
    %430 = arith.addi %401, %c7_i32_66 : i32
    %431 = arith.index_cast %arg0 : i32 to index
    %432 = arith.index_cast %430 : i32 to index
    %433 = memref.load %arg2[%431, %432] : memref<2x72xf32, #tpu.memory_space<smem>>
    %c8_i32_67 = arith.constant 8 : i32
    %434 = arith.addi %401, %c8_i32_67 : i32
    %435 = arith.index_cast %arg0 : i32 to index
    %436 = arith.index_cast %434 : i32 to index
    %437 = memref.load %arg2[%435, %436] : memref<2x72xf32, #tpu.memory_space<smem>>
    %c9_i32_68 = arith.constant 9 : i32
    %438 = arith.addi %401, %c9_i32_68 : i32
    %439 = arith.index_cast %arg0 : i32 to index
    %440 = arith.index_cast %438 : i32 to index
    %441 = memref.load %arg2[%439, %440] : memref<2x72xf32, #tpu.memory_space<smem>>
    %c10_i32_69 = arith.constant 10 : i32
    %442 = arith.addi %401, %c10_i32_69 : i32
    %443 = arith.index_cast %arg0 : i32 to index
    %444 = arith.index_cast %442 : i32 to index
    %445 = memref.load %arg2[%443, %444] : memref<2x72xf32, #tpu.memory_space<smem>>
    %c11_i32_70 = arith.constant 11 : i32
    %446 = arith.addi %401, %c11_i32_70 : i32
    %447 = arith.index_cast %arg0 : i32 to index
    %448 = arith.index_cast %446 : i32 to index
    %449 = memref.load %arg2[%447, %448] : memref<2x72xf32, #tpu.memory_space<smem>>
    %c12_i32_71 = arith.constant 12 : i32
    %450 = arith.addi %401, %c12_i32_71 : i32
    %451 = arith.index_cast %arg0 : i32 to index
    %452 = arith.index_cast %450 : i32 to index
    %453 = memref.load %arg2[%451, %452] : memref<2x72xf32, #tpu.memory_space<smem>>
    %c13_i32_72 = arith.constant 13 : i32
    %454 = arith.addi %401, %c13_i32_72 : i32
    %455 = arith.index_cast %arg0 : i32 to index
    %456 = arith.index_cast %454 : i32 to index
    %457 = memref.load %arg2[%455, %456] : memref<2x72xf32, #tpu.memory_space<smem>>
    %c14_i32_73 = arith.constant 14 : i32
    %458 = arith.addi %401, %c14_i32_73 : i32
    %459 = arith.index_cast %arg0 : i32 to index
    %460 = arith.index_cast %458 : i32 to index
    %461 = memref.load %arg2[%459, %460] : memref<2x72xf32, #tpu.memory_space<smem>>
    %c15_i32_74 = arith.constant 15 : i32
    %462 = arith.addi %401, %c15_i32_74 : i32
    %463 = arith.index_cast %arg0 : i32 to index
    %464 = arith.index_cast %462 : i32 to index
    %465 = memref.load %arg2[%463, %464] : memref<2x72xf32, #tpu.memory_space<smem>>
    %c16_i32_75 = arith.constant 16 : i32
    %466 = arith.addi %401, %c16_i32_75 : i32
    %467 = arith.index_cast %arg0 : i32 to index
    %468 = arith.index_cast %466 : i32 to index
    %469 = memref.load %arg2[%467, %468] : memref<2x72xf32, #tpu.memory_space<smem>>
    %c17_i32_76 = arith.constant 17 : i32
    %470 = arith.addi %401, %c17_i32_76 : i32
    %471 = arith.index_cast %arg0 : i32 to index
    %472 = arith.index_cast %470 : i32 to index
    %473 = memref.load %arg2[%471, %472] : memref<2x72xf32, #tpu.memory_space<smem>>
    %474 = vector.broadcast %405 : f32 to vector<8x128xf32>
    %475 = arith.mulf %474, %1 : vector<8x128xf32>
    %476 = vector.broadcast %409 : f32 to vector<8x128xf32>
    %477 = arith.mulf %476, %3 : vector<8x128xf32>
    %478 = arith.addf %475, %477 : vector<8x128xf32>
    %479 = vector.broadcast %413 : f32 to vector<8x128xf32>
    %480 = arith.addf %478, %479 : vector<8x128xf32>
    %481 = vector.broadcast %417 : f32 to vector<8x128xf32>
    %482 = arith.mulf %481, %1 : vector<8x128xf32>
    %483 = vector.broadcast %421 : f32 to vector<8x128xf32>
    %484 = arith.mulf %483, %3 : vector<8x128xf32>
    %485 = arith.addf %482, %484 : vector<8x128xf32>
    %486 = vector.broadcast %425 : f32 to vector<8x128xf32>
    %487 = arith.addf %485, %486 : vector<8x128xf32>
    %cst_77 = arith.constant 1.000000e+00 : f32
    %488 = vector.broadcast %cst_77 : f32 to vector<8x128xf32>
    %489 = arith.subf %488, %480 : vector<8x128xf32>
    %490 = arith.subf %489, %487 : vector<8x128xf32>
    %491 = vector.broadcast %429 : f32 to vector<8x128xf32>
    %492 = arith.mulf %480, %491 : vector<8x128xf32>
    %493 = vector.broadcast %437 : f32 to vector<8x128xf32>
    %494 = arith.addf %493, %492 : vector<8x128xf32>
    %495 = vector.broadcast %433 : f32 to vector<8x128xf32>
    %496 = arith.mulf %487, %495 : vector<8x128xf32>
    %497 = arith.addf %494, %496 : vector<8x128xf32>
    %498 = arith.minimumf %480, %487 : vector<8x128xf32>
    %499 = arith.minimumf %498, %490 : vector<8x128xf32>
    %cst_78 = arith.constant 0.000000e+00 : f32
    %500 = vector.broadcast %cst_78 : f32 to vector<8x128xf32>
    %501 = arith.cmpf oge, %499, %500 : vector<8x128xf32>
    %cst_79 = arith.constant 0.000000e+00 : f32
    %502 = vector.broadcast %cst_79 : f32 to vector<8x128xf32>
    %503 = arith.cmpf ogt, %497, %502 : vector<8x128xf32>
    %504 = arith.andi %501, %503 : vector<8x128xi1>
    %505 = arith.cmpf olt, %497, %397 : vector<8x128xf32>
    %506 = arith.andi %504, %505 : vector<8x128xi1>
    %507 = vector.broadcast %441 : f32 to vector<8x128xf32>
    %508 = arith.mulf %480, %507 : vector<8x128xf32>
    %509 = vector.broadcast %449 : f32 to vector<8x128xf32>
    %510 = arith.addf %509, %508 : vector<8x128xf32>
    %511 = vector.broadcast %445 : f32 to vector<8x128xf32>
    %512 = arith.mulf %487, %511 : vector<8x128xf32>
    %513 = arith.addf %510, %512 : vector<8x128xf32>
    %514 = vector.broadcast %453 : f32 to vector<8x128xf32>
    %515 = arith.mulf %480, %514 : vector<8x128xf32>
    %516 = vector.broadcast %461 : f32 to vector<8x128xf32>
    %517 = arith.addf %516, %515 : vector<8x128xf32>
    %518 = vector.broadcast %457 : f32 to vector<8x128xf32>
    %519 = arith.mulf %487, %518 : vector<8x128xf32>
    %520 = arith.addf %517, %519 : vector<8x128xf32>
    %521 = vector.broadcast %465 : f32 to vector<8x128xf32>
    %522 = arith.mulf %480, %521 : vector<8x128xf32>
    %523 = vector.broadcast %473 : f32 to vector<8x128xf32>
    %524 = arith.addf %523, %522 : vector<8x128xf32>
    %525 = vector.broadcast %469 : f32 to vector<8x128xf32>
    %526 = arith.mulf %487, %525 : vector<8x128xf32>
    %527 = arith.addf %524, %526 : vector<8x128xf32>
    %528 = arith.select %506, %497, %397 : vector<8x128xi1>, vector<8x128xf32>
    %529 = arith.select %506, %513, %398 : vector<8x128xi1>, vector<8x128xf32>
    %530 = arith.select %506, %520, %399 : vector<8x128xi1>, vector<8x128xf32>
    %531 = arith.select %506, %527, %400 : vector<8x128xi1>, vector<8x128xf32>
    %c4_i32_80 = arith.constant 4 : i32
    %c0_81 = arith.constant 0 : index
    %c0_82 = arith.constant 0 : index
    %c0_83 = arith.constant 0 : index
    %c0_84 = arith.constant 0 : index
    %532 = vector.load %arg4[%c0_81, %c0_82, %c0_83, %c0_84] : memref<1x4x8x128xf32, #tpu.memory_space<vmem>>, vector<1x1x8x128xf32>
    %533 = vector.shape_cast %532 : vector<1x1x8x128xf32> to vector<8x128xf32>
    %534 = vector.shape_cast %529 : vector<8x128xf32> to vector<1x1x8x128xf32>
    tpu.vector_store %arg4[%c0_81, %c0_82, %c0_83, %c0_84], %534 {strides = array<i32>} : memref<1x4x8x128xf32, #tpu.memory_space<vmem>>, vector<1x1x8x128xf32>,
    %c0_85 = arith.constant 0 : index
    %c1_86 = arith.constant 1 : index
    %c0_87 = arith.constant 0 : index
    %c0_88 = arith.constant 0 : index
    %535 = vector.load %arg4[%c0_85, %c1_86, %c0_87, %c0_88] : memref<1x4x8x128xf32, #tpu.memory_space<vmem>>, vector<1x1x8x128xf32>
    %536 = vector.shape_cast %535 : vector<1x1x8x128xf32> to vector<8x128xf32>
    %537 = vector.shape_cast %530 : vector<8x128xf32> to vector<1x1x8x128xf32>
    tpu.vector_store %arg4[%c0_85, %c1_86, %c0_87, %c0_88], %537 {strides = array<i32>} : memref<1x4x8x128xf32, #tpu.memory_space<vmem>>, vector<1x1x8x128xf32>,
    %c0_89 = arith.constant 0 : index
    %c2 = arith.constant 2 : index
    %c0_90 = arith.constant 0 : index
    %c0_91 = arith.constant 0 : index
    %538 = vector.load %arg4[%c0_89, %c2, %c0_90, %c0_91] : memref<1x4x8x128xf32, #tpu.memory_space<vmem>>, vector<1x1x8x128xf32>
    %539 = vector.shape_cast %538 : vector<1x1x8x128xf32> to vector<8x128xf32>
    %540 = vector.shape_cast %531 : vector<8x128xf32> to vector<1x1x8x128xf32>
    tpu.vector_store %arg4[%c0_89, %c2, %c0_90, %c0_91], %540 {strides = array<i32>} : memref<1x4x8x128xf32, #tpu.memory_space<vmem>>, vector<1x1x8x128xf32>,
    %cst_92 = arith.constant 1.000000e+00 : f32
    %541 = vector.broadcast %cst_92 : f32 to vector<8x128xf32>
    %c0_93 = arith.constant 0 : index
    %c3 = arith.constant 3 : index
    %c0_94 = arith.constant 0 : index
    %c0_95 = arith.constant 0 : index
    %542 = vector.load %arg4[%c0_93, %c3, %c0_94, %c0_95] : memref<1x4x8x128xf32, #tpu.memory_space<vmem>>, vector<1x1x8x128xf32>
    %543 = vector.shape_cast %542 : vector<1x1x8x128xf32> to vector<8x128xf32>
    %544 = vector.shape_cast %541 : vector<8x128xf32> to vector<1x1x8x128xf32>
    tpu.vector_store %arg4[%c0_93, %c3, %c0_94, %c0_95], %544 {strides = array<i32>} : memref<1x4x8x128xf32, #tpu.memory_space<vmem>>, vector<1x1x8x128xf32>,
    return
  }
  func.func @transform_0(%arg0: i32, %arg1: i32) -> (i32, i32) {
    %c0_i32 = arith.constant 0 : i32
    %c0_i32_0 = arith.constant 0 : i32
    %c0_i32_1 = arith.constant 0 : i32
    return %c0_i32, %c0_i32_0 : i32, i32
  }
  func.func @transform_1(%arg0: i32, %arg1: i32) -> (i32, i32, i32) {
    %c0_i32 = arith.constant 0 : i32
    %c0_i32_0 = arith.constant 0 : i32
    %c0_i32_1 = arith.constant 0 : i32
    return %c0_i32, %arg1, %c0_i32_0 : i32, i32, i32
  }
  func.func @transform_2(%arg0: i32, %arg1: i32) -> (i32, i32, i32, i32) {
    %c0_i32 = arith.constant 0 : i32
    %c0_i32_0 = arith.constant 0 : i32
    %c0_i32_1 = arith.constant 0 : i32
    return %arg0, %c0_i32, %arg1, %c0_i32_0 : i32, i32, i32, i32
  }
}

</mosaic_0001>

<bundles_post_ra>
// kernel: tpu_custom_call.1
= control target key start
LH: loop header
LB: loop body
LE: loop exit
PB: predicated region body
PF: predicated region fallthrough
CT: control target
= control target key end

     0   :  { %s1558_s0 = inlined_call_operand.hbm [shape: f32[2,72], index: 0, kind: input, shape index: {}]   ;;  %s1559_s1 = inlined_call_operand.hbm [shape: f32[2,8,128], index: 1, kind: input, shape index: {}]   ;;  %s1560_s2 = inlined_call_operand.hbm [shape: f32[2,4,8,128], index: 2, kind: output, shape index: {}]  }
   0x1   :  { %1570 = sst [smem:[#allocation18_spill]] %s1558_s0 }
   0x2   :  { %1571 = sst [smem:[#allocation19_spill]] %s1559_s1 }
   0x3   :  { %7 = vsyncpa [#allocation5], 0 }
   0x4   :  { %8 = vsyncpa [#allocation3], 0 }
   0x5   :  { %9 = vsyncpa [#allocation4], 0 }
   0x6   :  { %11 = vsyncpa [#allocation4 + $0x1], 0  ;;  %s896_s9 = smov 0   ;;  %s898_s10 = smov 0  }
   0x7   :  { %s900_s11 = smov 0   ;;  %s902_s12 = smov 0  }
   0x8   :  { %s904_s13 = smov 0   ;;  %s906_s14 = smov 0  }
   0x9 LB: > { %1572 = sst [smem:[#allocation11_spill]] %s851_s9  ;;  %s644_s15 = sadd.s32 4294967295, %s871_s14   ;;  %s871_s14 = sphi %s906_s14, %s17_s14   ;;  %s867_s13 = sphi %s904_s13, %s1609_s13   ;;  %s863_s12 = sphi %s902_s12, %s1608_s12   ;;  %s859_s11 = sphi %s900_s11, %s1607_s11   ;;  %s855_s10 = sphi %s898_s10, %s1611_s10   ;;  %s851_s9 = sphi %s896_s9, %s1610_s9  }
   0xa   : > { %1573 = sst [smem:[#allocation12_spill]] %s859_s11  ;;  %s645_s16 = sadd.s32 4294967294, %s871_s14  }
   0xb   : > { %1574 = sst [smem:[#allocation13_spill]] %s867_s13  ;;  %s29_s17 = sadd.s32 1, %s867_s13 }
   0xc   : > { %1575 = sst [smem:[#allocation14_spill]] %s871_s14  ;;  %s85_s18 = sadd.s32 1, %s859_s11 }
   0xd   : > { %p31_p0 = scmp.ge.s32.totalorder %s29_s17, 2  ;;  %p95_p1 = scmp.ne.s32.totalorder %s859_s11, %s855_s10 }
   0xe   : > { %p96_p2 = scmp.eq.s32.totalorder %s644_s15, 1  ;;  %p101_p3 = scmp.ne.s32.totalorder %s855_s10, %s851_s9 }
   0xf   : > { %s1613_s17 = smov (%p31_p0, %s29_s17), 0  ;;  %p102_p5 = scmp.eq.s32.totalorder %s645_s16, 1 }
  0x10   : > { %1576 = sst [smem:[#allocation15_spill]] %s1613_s17  ;;  %p936_p4 = por %p96_p2, %p95_p1 }
  0x11   : > { %s80_s20 = ssub.s32 %s867_s13, %s1613_s17  ;;  %p646_p6 = scmp.ge.s32.totalorder %s871_s14, 1 }
  0x12   : > { %s1577_s19 = scalar_select %p936_p4, 1, 0 }
  0x13   : > { %p83_p7 = scmp.eq.s32.totalorder %s80_s20, 0  ;;  %p943_p8 = por %p102_p5, %p101_p3 }
  0x14   : > { %p109_p9 = scmp.lt.s32.totalorder %s871_s14, 3  ;;  %p955_p11 = scmp.eq.s32.totalorder %s644_s15, 0 }
  0x15   : > { %s1578_s21 = scalar_select %p943_p8, 1, 0 }
  0x16   : > { %s949_s22 = scalar_select %p83_p7, %s859_s11, %s85_s18  }
  0x17   : > { %1579 = sst [smem:[#allocation16_spill]] %s1578_s21  ;;  %p951_p10 = pnand %p646_p6, %p109_p9 }
  0x18   : > { %1580 = sst [smem:[#allocation17_spill]] %s949_s22  ;;  %s873_s25 = smov [#allocation6]  }
  0x19   : > { %p673_p12 = pneg %p951_p10  ;;  %s132_s26 = sshll.u32 %s873_s25, 4  ;;  %s967_s26 = int_to_ptr.vmem [resolvable:$true] %s132_s26 }
  0x1a   : > { %s1584_s0 = sld [smem:[#allocation18_spill]] }
  0x1b   : > { %p963_p13 = pnand %p955_p11, %p673_p12 }
  0x1d   : > { %p746_p1 = pneg %p963_p13 }
  0x20   : > { %s744_s30 = scalar_lea.hbm %s1584_s0, 32 }
  0x21   : > { %p745_p0 = scmp.ne.s32.totalorder %s1584_s0, %s744_s30  ;;  %p751_p5 = scmp.lt.u32.totalorder %s744_s30, %s1584_s0 }
  0x23   : > { %p747_p2 = pnand %p746_p1, %p745_p0 }
  0x25   : > { %p748_p3 = pneg %p747_p2 }
  0x27   : > { %p753_p6 = pnand %p751_p5, %p748_p3 }
  0x29   : > { %756 = shalt.err (!%p753_p6)
}
  0x2a   : > { %s874_s7 = smov [#allocation2]   ;;  %s1585_s1 = sld [smem:[#allocation19_spill]] }
  0x2b   : > { %676 = dma.hbm_to_smem (!%p963_p13), %s1584_s0, 32, %s874_s7, [#allocation5]  }
  0x30   : > { %s757_s20 = scalar_lea.hbm %s1585_s1, 256 }
  0x31   : > { %p758_p7 = scmp.ne.s32.totalorder %s1585_s1, %s757_s20  ;;  %p764_p0 = scmp.lt.u32.totalorder %s757_s20, %s1585_s1 }
  0x33   : > { %p760_p9 = pnand %p758_p7, %p746_p1 }
  0x35   : > { %p761_p12 = pneg %p760_p9 }
  0x37   : > { %p766_p2 = pnand %p764_p0, %p761_p12 }
  0x39   : > { %769 = shalt.err (!%p766_p2)
}
  0x3a   : > { %s770_s3 = scalar_lea.vmem %s967_s26, 256  ;;  %p778_p8 = scmp.lt.s32.totalorder %s967_s26, %s967_s26 }
  0x3b   : > { %p771_p3 = scmp.ne.s32.totalorder %s967_s26, %s770_s3  ;;  %p779_p7 = scmp.lt.s32.totalorder %s770_s3, %s770_s3 }
  0x3d   : > { %p773_p5 = pnand %p771_p3, %p746_p1  ;;  %p780_p9 = por %p779_p7, %p778_p8 }
  0x3f   : > { %p774_p6 = pneg %p773_p5 }
  0x41   : > { %p781_p4 = pnand %p780_p9, %p774_p6 }
  0x43   : > { %784 = shalt.err (!%p781_p4)
}
  0x44   : > { %s875_s4 = smov 128   ;;  %s876_s5 = smov 8  }
  0x45   : > { %679 = dma.hbm_to_vmem [thread:$0]  (!%p963_p13), %s1585_s1, 256, %s967_s26, [#allocation3], %s875_s4, %s875_s4, %s876_s5  }
  0x46   : > { %148 = sbr.rel (%p951_p10) target bundleno = 183 (0xb7), region = 28 }
  0x4d   : > { %838 = dma.done.wait (%p955_p11), [#allocation5], 32  }
  0x4e   : > { %840 = vsyncadd (%p955_p11), [#allocation5], 4294967264 }
  0x4f   : > { %842 = dma.done.wait (%p955_p11), [#allocation3], 256  }
  0x50   : > { %844 = vsyncadd (%p955_p11), [#allocation3], 4294967040 }
  0x51   : > { %158 = sfence }
  0x52   : > { %s1562_s26 = sand.u32 1, %s855_s10   ;;  %s1025_s27 = sshll.u32 %s863_s12, 7  ;;  %v877_v0 = vmov 1.0   ;;  %v1050_v1 = vld [vmem:[#allocation6] sm:$0xff]  ;;  %v1052_v2 = vld [vmem:[#allocation6 + $0x8] sm:$0xff] }
  0x53   : > { %s652_s23 = sshll.u32 %s1562_s26, 5  ;;  %s174_s8 = sld [smem:[#allocation2 + %s1025_s27]] }
  0x54   : > { %s175_s24 = sadd.s32 1, %s1025_s27  ;;  %s177_s16 = sadd.s32 2, %s1025_s27 }
  0x55   : > { %s176_s15 = sld [smem:[#allocation2 + %s175_s24]]  ;;  %s1032_s18 = scalar_lea.vmem [#allocation7], %s652_s23 }
  0x56   : > { %656 = vst [vmem:[%s1032_s18 + $0x18] sm:$0xff] %v877_v0  ;;  %s1035_s20 = sld [smem:[#allocation2 + %s177_s16]]  ;;  %s179_s25 = sadd.s32 3, %s1025_s27 }
  0x57   : > { %s1038_s28 = sld [smem:[#allocation2 + %s179_s25]]  ;;  %s181_s29 = sadd.s32 4, %s1025_s27 }
  0x58   : > { %s1041_s30 = sld [smem:[#allocation2 + %s181_s29]]  ;;  %s183_s3 = sadd.s32 5, %s1025_s27 }
  0x59   : > { %s1044_s4 = sld [smem:[#allocation2 + %s183_s3]]  ;;  %s185_s5 = sadd.s32 6, %s1025_s27  ;;  %v209_v3 = vstv %s174_s8 }
  0x5a   : > { %s1047_s6 = sld [smem:[#allocation2 + %s185_s5]]  ;;  %s187_s7 = sadd.s32 7, %s1025_s27  ;;  %v210_v5 = vmul.f32 %v209_v3, %v1050_v1 }
  0x5b   : > { %s1054_s23 = sld [smem:[#allocation2 + %s187_s7]]  ;;  %s189_s24 = sadd.s32 8, %s1025_s27  ;;  %v211_v4 = vstv %s176_s15 }
  0x5c   : > { %s1057_s16 = sld [smem:[#allocation2 + %s189_s24]]  ;;  %s191_s25 = sadd.s32 9, %s1025_s27  ;;  %v212_v6 = vmul.f32 %v211_v4, %v1052_v2  ;;  %v214_v10 = vstv %s1035_s20 }
  0x5d   : > { %s1060_s29 = sld [smem:[#allocation2 + %s191_s25]]  ;;  %s193_s3 = sadd.s32 10, %s1025_s27  ;;  %v216_v7 = vstv %s1038_s28 }
  0x5e   : > { %s1063_s5 = sld [smem:[#allocation2 + %s193_s3]]  ;;  %s195_s26 = sadd.s32 11, %s1025_s27  ;;  %v218_v8 = vstv %s1041_s30  ;;  %v213_v9 = vadd.f32 %v212_v6, %v210_v5  ;;  %v217_v11 = vmul.f32 %v216_v7, %v1050_v1 }
  0x5f   : > { %s1068_s7 = sld [smem:[#allocation2 + %s195_s26]]  ;;  %s197_s8 = sadd.s32 12, %s1025_s27  ;;  %v219_v12 = vmul.f32 %v218_v8, %v1052_v2  ;;  %v221_v16 = vstv %s1044_s4 }
  0x60   : > { %s1071_s15 = sld [smem:[#allocation2 + %s197_s8]]  ;;  %s199_s24 = sadd.s32 13, %s1025_s27  ;;  %v1094_v13 = vadd.f32 %v214_v10, %v213_v9  ;;  %v225_v15 = vstv %s1047_s6 }
  0x61   : > { %s1076_s25 = sld [smem:[#allocation2 + %s199_s24]]  ;;  %s201_s3 = sadd.s32 14, %s1025_s27  ;;  %v220_v14 = vadd.f32 %v219_v12, %v217_v11  ;;  %v229_v21 = vstv %s1054_s23 }
  0x62   : > { %s1079_s0 = sld [smem:[#allocation2 + %s201_s3]]  ;;  %s203_s1 = sadd.s32 15, %s1025_s27  ;;  %v226_v17 = vmul.f32 %v225_v15, %v1094_v13  ;;  %v223_v19 = vsub.f32 1.0, %v1094_v13  ;;  %v227_v20 = vstv %s1057_s16 }
  0x63   : > { %s1082_s26 = sld [smem:[#allocation2 + %s203_s1]]  ;;  %s205_s17 = sadd.s32 16, %s1025_s27  ;;  %v1110_v18 = vadd.f32 %v221_v16, %v220_v14  ;;  %v239_v37 = vstv %s1060_s29 }
  0x64   : > { %s1088_s28 = sld [smem:[#allocation2 + %s205_s17]]  ;;  %s207_s30 = sadd.s32 17, %s1025_s27  ;;  %v228_v24 = vadd.f32 %v227_v20, %v226_v17  ;;  %v240_v40 = vmul.f32 %v239_v37, %v1094_v13  ;;  %v243_v47 = vstv %s1063_s5 }
  0x65   : > { %s1091_s8 = sld [smem:[#allocation2 + %s207_s30]]  ;;  %s264_s24 = sadd.s32 18, %s1025_s27  ;;  %v224_v27 = vsub.f32 %v223_v19, %v1110_v18  ;;  %v230_v28 = vmul.f32 %v229_v21, %v1110_v18  ;;  %v232_v29 = vmin.f32 %v1094_v13, %v1110_v18  ;;  %v241_v46 = vstv %s1068_s7 }
  0x66   : > { %s265_s1 = sld [smem:[#allocation2 + %s264_s24]]  ;;  %s266_s3 = sadd.s32 19, %s1025_s27  ;;  %v246_v39 = vstv %s1071_s15  ;;  %v242_v58 = vadd.f32 %v241_v46, %v240_v40  ;;  %v244_v60 = vmul.f32 %v243_v47, %v1110_v18 }
  0x67   : > { %s267_s20 = sld [smem:[#allocation2 + %s266_s3]]  ;;  %s268_s13 = sadd.s32 20, %s1025_s27  ;;  %v1149_v35 = vadd.f32 %v230_v28, %v228_v24  ;;  %v233_v36 = vmin.f32 %v232_v29, %v224_v27  ;;  %v247_v48 = vmul.f32 %v246_v39, %v1094_v13  ;;  %v250_v49 = vstv %s1076_s25 }
  0x68   : > { %s1100_s17 = sld [smem:[#allocation2 + %s268_s13]]  ;;  %s270_s22 = sadd.s32 21, %s1025_s27  ;;  %v248_v50 = vstv %s1079_s0  ;;  %v251_v62 = vmul.f32 %v250_v49, %v1110_v18 }
  0x69   : > { %s1103_s30 = sld [smem:[#allocation2 + %s270_s22]]  ;;  %s272_s11 = sadd.s32 22, %s1025_s27  ;;  %v253_v41 = vstv %s1082_s26  ;;  %vm234_vm0 = vcmp.ge.f32.partialorder %v233_v36, 0.0  ;;  %vm235_vm1 = vcmp.gt.f32.partialorder %v1149_v35, 0.0  ;;  %vm237_vm2 = vcmp.lt.f32.partialorder %v1149_v35, 1e+10 }
  0x6a   : > { %s1107_s24 = sld [smem:[#allocation2 + %s272_s11]]  ;;  %s274_s21 = sadd.s32 23, %s1025_s27  ;;  %v254_v51 = vmul.f32 %v253_v41, %v1094_v13  ;;  %v257_v52 = vstv %s1088_s28  ;;  %vm1193_vm3 = vmand %vm234_vm0, %vm235_vm1  ;;  %v249_v61 = vadd.f32 %v248_v50, %v247_v48  ;;  %v1241_v13 = vadd.f32 %v244_v60, %v242_v58 }
  0x6b   : > { %s1114_s6 = sld [smem:[#allocation2 + %s274_s21]]  ;;  %s276_s13 = sadd.s32 24, %s1025_s27  ;;  %v255_v54 = vstv %s1091_s8  ;;  %vm1219_vm4 = vmand %vm1193_vm3, %vm237_vm2  ;;  %v258_v4 = vmul.f32 %v257_v52, %v1110_v18 }
  0x6c   : > { %s1118_s4 = sld [smem:[#allocation2 + %s276_s13]]  ;;  %s278_s22 = sadd.s32 25, %s1025_s27  ;;  %v300_v22 = vstv %s265_s1  ;;  %v256_v3 = vadd.f32 %v255_v54, %v254_v51  ;;  %v1243_v14 = vadd.f32 %v251_v62, %v249_v61  ;;  %v1248_v15 = vsel %vm1219_vm4, %v1149_v35, 1e+10 }
  0x6d   : > { %s1121_s11 = sld [smem:[#allocation2 + %s278_s22]]  ;;  %s280_s3 = sadd.s32 26, %s1025_s27  ;;  %v302_v23 = vstv %s267_s20  ;;  %v301_v25 = vmul.f32 %v300_v22, %v1050_v1  ;;  %v261_v60 = vsel %vm1219_vm4, %v1241_v13, 1.0 }
  0x6e   : > { %s1124_s9 = sld [smem:[#allocation2 + %s280_s3]]  ;;  %s282_s21 = sadd.s32 27, %s1025_s27  ;;  %v303_v26 = vmul.f32 %v302_v23, %v1052_v2  ;;  %v305_v38 = vstv %s1100_s17  ;;  %v1254_v17 = vadd.f32 %v258_v4, %v256_v3  ;;  %v262_v61 = vsel %vm1219_vm4, %v1243_v14, 1.0 }
  0x6f   : > { %s1133_s23 = sld [smem:[#allocation2 + %s282_s21]]  ;;  %s284_s16 = sadd.s32 28, %s1025_s27  ;;  %v307_v30 = vstv %s1103_s30 }
  0x70   : > { %s1137_s1 = sld [smem:[#allocation2 + %s284_s16]]  ;;  %s286_s20 = sadd.s32 29, %s1025_s27  ;;  %v309_v31 = vstv %s1107_s24  ;;  %v304_v32 = vadd.f32 %v303_v26, %v301_v25  ;;  %v308_v33 = vmul.f32 %v307_v30, %v1050_v1  ;;  %v263_v3 = vsel %vm1219_vm4, %v1254_v17, 1.0 }
  0x71   : > { %s1141_s13 = sld [smem:[#allocation2 + %s286_s20]]  ;;  %s288_s22 = sadd.s32 30, %s1025_s27  ;;  %v310_v34 = vmul.f32 %v309_v31, %v1052_v2  ;;  %v312_v44 = vstv %s1114_s6 }
  0x72   : > { %s1144_s3 = sld [smem:[#allocation2 + %s288_s22]]  ;;  %s290_s14 = sadd.s32 31, %s1025_s27  ;;  %v1168_v42 = vadd.f32 %v305_v38, %v304_v32  ;;  %v316_v45 = vstv %s1118_s4 }
  0x73   : > { %s1152_s30 = sld [smem:[#allocation2 + %s290_s14]]  ;;  %s292_s24 = sadd.s32 32, %s1025_s27  ;;  %v311_v43 = vadd.f32 %v310_v34, %v308_v33  ;;  %v320_v63 = vstv %s1121_s11 }
  0x74   : > { %s1156_s21 = sld [smem:[#allocation2 + %s292_s24]]  ;;  %s294_s16 = sadd.s32 33, %s1025_s27  ;;  %v314_v56 = vsub.f32 1.0, %v1168_v42  ;;  %v317_v57 = vmul.f32 %v316_v45, %v1168_v42  ;;  %v318_v59 = vstv %s1124_s9 }
  0x75   : > { %s1160_s20 = sld [smem:[#allocation2 + %s294_s16]]  ;;  %s296_s22 = sadd.s32 34, %s1025_s27  ;;  %v1198_v55 = vadd.f32 %v312_v44, %v311_v43  ;;  %v330_v7 = vstv %s1133_s23 }
  0x76   : > { %s1165_s14 = sld [smem:[#allocation2 + %s296_s22]]  ;;  %s298_s29 = sadd.s32 35, %s1025_s27  ;;  %v319_v6 = vadd.f32 %v318_v59, %v317_v57  ;;  %v331_v18 = vmul.f32 %v330_v7, %v1168_v42  ;;  %v334_v27 = vstv %s1137_s1 }
  0x77   : > { %s1171_s15 = sld [smem:[#allocation2 + %s298_s29]]  ;;  %s355_s17 = sadd.s32 36, %s1025_s27  ;;  %v315_v5 = vsub.f32 %v314_v56, %v1198_v55  ;;  %v321_v9 = vmul.f32 %v320_v63, %v1198_v55  ;;  %v323_v10 = vmin.f32 %v1168_v42, %v1198_v55  ;;  %v332_v29 = vstv %s1141_s13 }
  0x78   : > { %s1180_s26 = sld [smem:[#allocation2 + %s355_s17]]  ;;  %s357_s24 = sadd.s32 37, %s1025_s27  ;;  %v337_v21 = vstv %s1144_s3  ;;  %v333_v44 = vadd.f32 %v332_v29, %v331_v18  ;;  %v335_v52 = vmul.f32 %v334_v27, %v1198_v55 }
  0x79   : > { %s1187_s6 = sld [smem:[#allocation2 + %s357_s24]]  ;;  %s359_s7 = sadd.s32 38, %s1025_s27  ;;  %v1268_v25 = vadd.f32 %v321_v9, %v319_v6  ;;  %v324_v26 = vmin.f32 %v323_v10, %v315_v5  ;;  %v338_v33 = vmul.f32 %v337_v21, %v1168_v42  ;;  %v341_v34 = vstv %s1152_s30 }
  0x7a   : > { %s1202_s0 = sld [smem:[#allocation2 + %s359_s7]]  ;;  %s361_s5 = sadd.s32 39, %s1025_s27  ;;  %v339_v41 = vstv %s1156_s21  ;;  %v342_v54 = vmul.f32 %v341_v34, %v1198_v55  ;;  %v336_v4 = vadd.f32 %v335_v52, %v333_v44 }
  0x7b   : > { %s1206_s25 = sld [smem:[#allocation2 + %s361_s5]]  ;;  %s363_s28 = sadd.s32 40, %s1025_s27  ;;  %v344_v35 = vstv %s1160_s20  ;;  %vm325_vm5 = vcmp.ge.f32.partialorder %v324_v26, 0.0  ;;  %vm326_vm6 = vcmp.gt.f32.partialorder %v1268_v25, 0.0  ;;  %vm328_vm8 = vcmp.lt.f32.partialorder %v1268_v25, %v1248_v15 }
  0x7c   : > { %s1212_s8 = sld [smem:[#allocation2 + %s363_s28]]  ;;  %s365_s4 = sadd.s32 41, %s1025_s27  ;;  %v345_v45 = vmul.f32 %v344_v35, %v1168_v42  ;;  %v348_v47 = vstv %s1165_s14  ;;  %vm1319_vm7 = vmand %vm325_vm5, %vm326_vm6  ;;  %v340_v53 = vadd.f32 %v339_v41, %v338_v33 }
  0x7d   : > { %s1224_s9 = sld [smem:[#allocation2 + %s365_s4]]  ;;  %s367_s16 = sadd.s32 42, %s1025_s27  ;;  %v346_v46 = vstv %s1171_s15  ;;  %v349_v58 = vmul.f32 %v348_v47, %v1198_v55  ;;  %vm1350_vm9 = vmand %vm1319_vm7, %vm328_vm8 }
  0x7e   : > { %s1229_s11 = sld [smem:[#allocation2 + %s367_s16]]  ;;  %s369_s22 = sadd.s32 43, %s1025_s27  ;;  %v391_v8 = vstv %s1180_s26  ;;  %v347_v57 = vadd.f32 %v346_v46, %v345_v45  ;;  %v343_v5 = vadd.f32 %v342_v54, %v340_v53 }
  0x7f   : > { %s1236_s29 = sld [smem:[#allocation2 + %s369_s22]]  ;;  %s371_s17 = sadd.s32 44, %s1025_s27  ;;  %v392_v11 = vmul.f32 %v391_v8, %v1050_v1  ;;  %v393_v12 = vstv %s1187_s6 }
  0x80   : > { %s1250_s23 = sld [smem:[#allocation2 + %s371_s17]]  ;;  %s373_s26 = sadd.s32 45, %s1025_s27  ;;  %v394_v16 = vmul.f32 %v393_v12, %v1052_v2  ;;  %v396_v19 = vstv %s1202_s0  ;;  %v350_v0 = vadd.f32 %v349_v58, %v347_v57  ;;  %v1422_v29 = vsel %vm1350_vm9, %v343_v5, %v262_v61 }
  0x81   : > { %s1257_s24 = sld [smem:[#allocation2 + %s373_s26]]  ;;  %s375_s6 = sadd.s32 46, %s1025_s27  ;;  %v398_v20 = vstv %s1206_s25 }
  0x82   : > { %s1263_s7 = sld [smem:[#allocation2 + %s375_s6]]  ;;  %s377_s5 = sadd.s32 47, %s1025_s27  ;;  %v395_v22 = vadd.f32 %v394_v16, %v392_v11  ;;  %v399_v23 = vmul.f32 %v398_v20, %v1050_v1  ;;  %v400_v24 = vstv %s1212_s8  ;;  %v1377_v11 = vsel %vm1350_vm9, %v1268_v25, %v1248_v15 }
  0x83   : > { %s1271_s0 = sld [smem:[#allocation2 + %s377_s5]]  ;;  %s379_s3 = sadd.s32 48, %s1025_s27  ;;  %v401_v28 = vmul.f32 %v400_v24, %v1052_v2  ;;  %v403_v31 = vstv %s1224_s9 }
  0x84   : > { %s1276_s25 = sld [smem:[#allocation2 + %s379_s3]]  ;;  %s381_s28 = sadd.s32 49, %s1025_s27  ;;  %v1279_v30 = vadd.f32 %v396_v19, %v395_v22  ;;  %v407_v32 = vstv %s1229_s11 }
  0x85   : > { %s1286_s1 = sld [smem:[#allocation2 + %s381_s28]]  ;;  %s383_s8 = sadd.s32 50, %s1025_s27  ;;  %v402_v36 = vadd.f32 %v401_v28, %v399_v23  ;;  %v411_v40 = vstv %s1236_s29  ;;  %v1418_v28 = vsel %vm1350_vm9, %v336_v4, %v261_v60 }
  0x86   : > { %s1289_s13 = sld [smem:[#allocation2 + %s383_s8]]  ;;  %s385_s4 = sadd.s32 51, %s1025_s27  ;;  %v405_v37 = vsub.f32 1.0, %v1279_v30  ;;  %v408_v38 = vmul.f32 %v407_v32, %v1279_v30  ;;  %v409_v39 = vstv %s1250_s23 }
  0x87   : > { %s1298_s30 = sld [smem:[#allocation2 + %s385_s4]]  ;;  %s387_s20 = sadd.s32 52, %s1025_s27  ;;  %v1301_v43 = vadd.f32 %v403_v31, %v402_v36  ;;  %v421_v56 = vstv %s1257_s24  ;;  %v1426_v31 = vsel %vm1350_vm9, %v350_v0, %v263_v3 }
  0x88   : > { %s1306_s9 = sld [smem:[#allocation2 + %s387_s20]]  ;;  %s389_s16 = sadd.s32 53, %s1025_s27  ;;  %v410_v49 = vadd.f32 %v409_v39, %v408_v38  ;;  %v422_v6 = vmul.f32 %v421_v56, %v1279_v30  ;;  %v425_v8 = vstv %s1263_s7 }
  0x89   : > { %s1309_s11 = sld [smem:[#allocation2 + %s389_s16]]  ;;  %v406_v48 = vsub.f32 %v405_v37, %v1301_v43  ;;  %v412_v50 = vmul.f32 %v411_v40, %v1301_v43  ;;  %v414_v51 = vmin.f32 %v1279_v30, %v1301_v43  ;;  %s446_s21 = sadd.s32 54, %s1025_s27  ;;  %v423_v7 = vstv %s1271_s0 }
  0x8a   : > { %s1327_s14 = sld [smem:[#allocation2 + %s446_s21]]  ;;  %s448_s15 = sadd.s32 55, %s1025_s27  ;;  %v428_v59 = vstv %s1276_s25  ;;  %v424_v15 = vadd.f32 %v423_v7, %v422_v6  ;;  %v426_v17 = vmul.f32 %v425_v8, %v1301_v43 }
  0x8b   : > { %s1331_s22 = sld [smem:[#allocation2 + %s448_s15]]  ;;  %s450_s29 = sadd.s32 56, %s1025_s27  ;;  %v1354_v62 = vadd.f32 %v412_v50, %v410_v49  ;;  %v415_v63 = vmin.f32 %v414_v51, %v406_v48  ;;  %v429_v9 = vmul.f32 %v428_v59, %v1279_v30  ;;  %v432_v10 = vstv %s1286_s1 }
  0x8c   : > { %s1336_s17 = sld [smem:[#allocation2 + %s450_s29]]  ;;  %s452_s23 = sadd.s32 57, %s1025_s27  ;;  %v430_v12 = vstv %s1289_s13  ;;  %v433_v18 = vmul.f32 %v432_v10, %v1301_v43 }
  0x8d   : > { %s1356_s26 = sld [smem:[#allocation2 + %s452_s23]]  ;;  %s454_s24 = sadd.s32 58, %s1025_s27  ;;  %vm416_vm10 = vcmp.ge.f32.partialorder %v415_v63, 0.0  ;;  %vm417_vm11 = vcmp.gt.f32.partialorder %v1354_v62, 0.0  ;;  %vm419_vm12 = vcmp.lt.f32.partialorder %v1354_v62, %v1377_v11  ;;  %v431_v20 = vadd.f32 %v430_v12, %v429_v9 }
  0x8e   : > { %s1363_s6 = sld [smem:[#allocation2 + %s454_s24]]  ;;  %s456_s5 = sadd.s32 59, %s1025_s27  ;;  %vm1406_vm13 = vmand %vm416_vm10, %vm417_vm11  ;;  %v435_v24 = vstv %s1298_s30  ;;  %v439_v32 = vstv %s1306_s9 }
  0x8f   : > { %s1370_s3 = sld [smem:[#allocation2 + %s456_s5]]  ;;  %s458_s25 = sadd.s32 60, %s1025_s27  ;;  %vm1443_vm14 = vmand %vm1406_vm13, %vm419_vm12  ;;  %v434_v37 = vadd.f32 %v433_v18, %v431_v20  ;;  %v436_v38 = vmul.f32 %v435_v24, %v1279_v30  ;;  %v437_v46 = vstv %s1309_s11  ;;  %v440_v47 = vmul.f32 %v439_v32, %v1301_v43 }
  0x90   : > { %s1380_s28 = sld [smem:[#allocation2 + %s458_s25]]  ;;  %s460_s0 = sadd.s32 61, %s1025_s27  ;;  %v482_v13 = vstv %s1327_s14  ;;  %v442_v49 = vsel %vm1443_vm14, %v1354_v62, %v1377_v11 }
  0x91   : > { %s1385_s7 = sld [smem:[#allocation2 + %s460_s0]]  ;;  %s462_s1 = sadd.s32 62, %s1025_s27  ;;  %v483_v14 = vmul.f32 %v482_v13, %v1050_v1  ;;  %v484_v16 = vstv %s1331_s22  ;;  %v438_v56 = vadd.f32 %v437_v46, %v436_v38  ;;  %v444_v8 = vsel %vm1443_vm14, %v434_v37, %v1422_v29 }
  0x92   : > { %s1392_s8 = sld [smem:[#allocation2 + %s462_s1]]  ;;  %s464_s13 = sadd.s32 63, %s1025_s27  ;;  %v485_v19 = vmul.f32 %v484_v16, %v1052_v2  ;;  %v487_v21 = vstv %s1336_s17 }
  0x93   : > { %s1398_s4 = sld [smem:[#allocation2 + %s464_s13]]  ;;  %s466_s20 = sadd.s32 64, %s1025_s27  ;;  %v489_v22 = vstv %s1356_s26  ;;  %v441_v7 = vadd.f32 %v440_v47, %v438_v56 }
  0x94   : > { %s1411_s16 = sld [smem:[#allocation2 + %s466_s20]]  ;;  %s468_s21 = sadd.s32 65, %s1025_s27  ;;  %v486_v25 = vadd.f32 %v485_v19, %v483_v14  ;;  %v490_v26 = vmul.f32 %v489_v22, %v1050_v1  ;;  %v491_v27 = vstv %s1363_s6 }
  0x95   : > { %s1428_s30 = sld [smem:[#allocation2 + %s468_s21]]  ;;  %s470_s14 = sadd.s32 66, %s1025_s27  ;;  %v492_v1 = vmul.f32 %v491_v27, %v1052_v2  ;;  %v494_v34 = vstv %s1370_s3  ;;  %v427_v2 = vadd.f32 %v426_v17, %v424_v15  ;;  %v445_v18 = vsel %vm1443_vm14, %v441_v7, %v1426_v31 }
  0x96   : > { %s1433_s15 = sld [smem:[#allocation2 + %s470_s14]]  ;;  %s472_s22 = sadd.s32 67, %s1025_s27  ;;  %v488_v33 = vadd.f32 %v487_v21, %v486_v25  ;;  %v498_v35 = vstv %s1380_s28 }
  0x97   : > { %s1448_s9 = sld [smem:[#allocation2 + %s472_s22]]  ;;  %s474_s29 = sadd.s32 68, %s1025_s27  ;;  %v493_v39 = vadd.f32 %v492_v1, %v490_v26  ;;  %v502_v45 = vstv %s1385_s7  ;;  %v443_v63 = vsel %vm1443_vm14, %v427_v2, %v1418_v28 }
  0x98   : > { %s1451_s17 = sld [smem:[#allocation2 + %s474_s29]]  ;;  %s476_s23 = sadd.s32 69, %s1025_s27  ;;  %v496_v40 = vsub.f32 1.0, %v488_v33  ;;  %v499_v41 = vmul.f32 %v498_v35, %v488_v33  ;;  %v500_v44 = vstv %s1392_s8 }
  0x99   : > { %s1458_s26 = sld [smem:[#allocation2 + %s476_s23]]  ;;  %s478_s24 = sadd.s32 70, %s1025_s27  ;;  %v495_v30 = vadd.f32 %v494_v34, %v493_v39  ;;  %v512_v48 = vstv %s1398_s4 }
  0x9a   : > { %s1466_s6 = sld [smem:[#allocation2 + %s478_s24]]  ;;  %s480_s5 = sadd.s32 71, %s1025_s27  ;;  %v501_v50 = vadd.f32 %v500_v44, %v499_v41  ;;  %v513_v51 = vmul.f32 %v512_v48, %v488_v33  ;;  %v516_v42 = vstv %s1411_s16 }
  0x9b   : > { %s1470_s11 = sld [smem:[#allocation2 + %s480_s5]]  ;;  %v497_v43 = vsub.f32 %v496_v40, %v495_v30  ;;  %v503_v52 = vmul.f32 %v502_v45, %v495_v30  ;;  %v505_v53 = vmin.f32 %v488_v33, %v495_v30  ;;  %v514_v54 = vstv %s1428_s30  ;;  %s662_s27 = sshll.u32 %s863_s12, 9 }
  0x9c   : > { %v515_v57 = vadd.f32 %v514_v54, %v513_v51  ;;  %v517_v58 = vmul.f32 %v516_v42, %v495_v30  ;;  %v519_v59 = vstv %s1433_s15  ;;  %s558_s3 = sshll.u32 %s1032_s18, 4  ;;  %s1503_s0 = scalar_lea.hbm %s1560_s2, %s662_s27  ;;  %s1505_s3 = int_to_ptr.vmem [resolvable:$true] %s558_s3 }
  0x9d   : > { %v504_v60 = vadd.f32 %v503_v52, %v501_v50  ;;  %v506_v61 = vmin.f32 %v505_v53, %v497_v43  ;;  %v520_v55 = vmul.f32 %v519_v59, %v488_v33  ;;  %v523_v62 = vstv %s1448_s9  ;;  %s1600_s12 = sand.u32 1, %s855_s10   ;;  %s785_s1 = scalar_lea.vmem %s1505_s3, 512 }
  0x9e   : > { %v518_v3 = vadd.f32 %v517_v58, %v515_v57  ;;  %v521_v4 = vstv %s1451_s17  ;;  %v524_v5 = vmul.f32 %v523_v62, %v495_v30  ;;  %s1512_s7 = scalar_lea.sflag [#allocation4], %s1600_s12  ;;  %p786_p4 = scmp.ne.s32.totalorder %s1505_s3, %s785_s1 }
  0x9f   : > { %vm507_vm15 = vcmp.ge.f32.partialorder %v506_v61, 0.0  ;;  %vm508_vm0 = vcmp.gt.f32.partialorder %v504_v60, 0.0  ;;  %vm510_vm1 = vcmp.lt.f32.partialorder %v504_v60, %v442_v49  ;;  %v522_v6 = vadd.f32 %v521_v4, %v520_v55  ;;  %p1601_p8 = scmp.ne.s32.totalorder %s1577_s19, 0  ;;  %s878_s8 = smov [#allocation7]  }
  0xa0   : > { %vm509_vm2 = vmand %vm507_vm15, %vm508_vm0  ;;  %v526_v9 = vstv %s1458_s26  ;;  %v530_v10 = vstv %s1466_s6  ;;  %s789_s13 = sshll.u32 %s878_s8, 4  ;;  %s790_s13 = int_to_ptr.vmem [resolvable:$false] %s789_s13 }
  0xa1   : > { %vm1484_vm3 = vmand %vm509_vm2, %vm510_vm1  ;;  %v525_v11 = vadd.f32 %v524_v5, %v522_v6  ;;  %v527_v12 = vmul.f32 %v526_v9, %v488_v33  ;;  %v528_v13 = vstv %s1470_s11  ;;  %v531_v14 = vmul.f32 %v530_v10, %v495_v30  ;;  %p787_p10 = pnand %p786_p4, %p1601_p8  ;;  %s791_s4 = scalar_lea.vmem %s790_s13, 1024 }
  0xa2   : > { %v533_v16 = vsel %vm1484_vm3, %v518_v3, %v443_v63  ;;  %p792_p13 = scmp.lt.s32.totalorder %s1505_s3, %s790_s13  ;;  %p793_p1 = scmp.lt.s32.totalorder %s791_s4, %s785_s1 }
  0xa3   : > { %v529_v15 = vadd.f32 %v528_v13, %v527_v12  ;;  %v534_v17 = vsel %vm1484_vm3, %v525_v11, %v444_v8  ;;  %536 = vst [vmem:[%s1032_s18] sm:$0xff] %v533_v16  ;;  %p788_p11 = pneg %p787_p10 }
  0xa4   : > { %654 = vst [vmem:[%s1032_s18 + $0x8] sm:$0xff] %v534_v17  ;;  %p794_p12 = por %p793_p1, %p792_p13 }
  0xa5   : > { %v532_v19 = vadd.f32 %v531_v14, %v529_v15 }
  0xa6   : > { %p795_p0 = pnand %p794_p12, %p788_p11 }
  0xa7   : > { %v535_v20 = vsel %vm1484_vm3, %v532_v19, %v445_v18 }
  0xa8   : > { %655 = vst [vmem:[%s1032_s18 + $0x10] sm:$0xff] %v535_v20 }
  0xa9   : > { %798 = shalt.err (!%p795_p0)
}
  0xaa   : > { %s799_s18 = scalar_lea.hbm %s1503_s0, 512  ;;  %s803_s21 = scalar_lea.hbm %s1560_s2, 1024 }
  0xab   : > { %p800_p2 = scmp.ne.s32.totalorder %s1503_s0, %s799_s18  ;;  %p804_p6 = scmp.lt.u32.totalorder %s1503_s0, %s1560_s2 }
  0xac   : > { %p805_p7 = scmp.lt.u32.totalorder %s803_s21, %s799_s18  ;;  %p807_p4 = scmp.lt.u32.totalorder %s799_s18, %s1503_s0 }
  0xad   : > { %p801_p3 = pnand %p800_p2, %p1601_p8 }
  0xae   : > { %p806_p9 = por %p805_p7, %p804_p6 }
  0xaf   : > { %p802_p5 = pneg %p801_p3 }
  0xb0   : > { %p808_p10 = por %p807_p4, %p806_p9 }
  0xb2   : > { %p809_p11 = pnand %p808_p10, %p802_p5 }
  0xb4   : > { %812 = shalt.err (!%p809_p11)
}
  0xb5   : > { %s879_s15 = smov 128   ;;  %s880_s22 = smov 8  }
  0xb6   : > { %671 = dma.vmem_to_hbm [thread:$0]  (%p1601_p8), %s1505_s3, 512, %s1503_s0, %s1512_s7, %s879_s15, %s879_s15, %s880_s22  }
  0xb7 PF: > { %s1602_s9 = sld [smem:[#allocation14_spill]]  ;;  %s1603_s29 = sld [smem:[#allocation11_spill]] }
  0xb8   : > { %s1604_s17 = sld [smem:[#allocation16_spill]] }
  0xbd   : > { %p688_p13 = scmp.ge.s32.totalorder %s1602_s9, 2  ;;  %s573_s23 = sand.u32 1, %s1603_s29  }
  0xbe   : > { %p1605_p1 = scmp.ne.s32.totalorder %s1604_s17, 0  ;;  %s574_s26 = scalar_lea.sflag [#allocation4], %s573_s23 }
  0xc0   : > { %p681_p12 = pnand %p688_p13, %p1605_p1 }
  0xc2   : > { %846 = dma.done.wait (!%p681_p12), %s574_s26, 512  }
  0xc3   : > { %848 = vsyncadd (!%p681_p12), %s574_s26, 4294966784  ;;  %s17_s14 = sadd.s32 1, %s1602_s9   ;;  %s1606_s24 = sld [smem:[#allocation12_spill]] }
  0xc4   : > { %p14_p0 = scmp.ge.s32.totalorder %s17_s14, 4   ;;  %s1607_s11 = sld [smem:[#allocation17_spill]] }
  0xc5   : > { %s1608_s12 = sld [smem:[#allocation13_spill]]  ;;  %s1609_s13 = sld [smem:[#allocation15_spill]] }
  0xc6   : > { %s1610_s9 = smov %s855_s10  ;;  %16 = sbr.rel (!%p14_p0) target bundleno = 9 (0x9), region = 75 }
  0xc9   : > { %s1611_s10 = smov %s1606_s24 }
  0xcd   :  { %579 = vsyncpa [#allocation3], 1 }
  0xce   :  { %581 = vsyncpa [#allocation3 + $0x1], 1 }
  0xcf   :  { %582 = vsyncpa [#allocation4], 1 }
  0xd0   :  { %584 = vsyncpa [#allocation4 + $0x1], 1 }
  0xd1   :  { %585 = vsyncpa [#allocation5], 1 }
  0xd2   :  { %587 = vsyncpa [#allocation5 + $0x1], 1 }

</bundles_post_ra>
